<compile_context>
chip_gen: v5e
topology: v5e:2x2
jax: 0.10.0
libtpu: 0.0.40
codegen_flags: <defaults>
</compile_context>

<pallas_src>
import jax
import jax.numpy as jnp
from jax.experimental import pallas as pl
from jax.experimental.pallas import tpu as pltpu


def hebbian_layer_kernel(w_ref, b_ref, patches_ref, lat_ref,
                         act_out_ref, lat_out_ref):
    # w_ref       : (C, K)      conv weight, K = C_in*9 ordered (c_in, kh, kw)
    # b_ref       : (C, 1)      conv bias
    # patches_ref : (K, B*N)    im2col of the padded input, columns ordered (b, n)
    # lat_ref     : (C, N, N)   lateral weights (pre-update)
    # act_out_ref : (C, B*N)    layer output activation, columns ordered (b, n)
    # lat_out_ref : (C, N, N)   updated lateral weights (aliases lat_ref's HBM)
    C, K = w_ref.shape
    N = lat_ref.shape[1]
    BN = patches_ref.shape[1]
    B = BN // N

    # Conv as ONE MXU matmul over the fused (b, n) axis: (C, K) @ (K, B*N).
    conv = jax.lax.dot_general(
        w_ref[...], patches_ref[...], (((1,), (0,)), ((), ())),
        preferred_element_type=jnp.float32)                      # (C, B*N)
    a = jnp.maximum(conv + b_ref[...], 0.0)                      # bias + ReLU

    # Per-(c, b) spatial L2 norm (PyTorch: act.norm(dim=(2,3))), with the
    # reciprocal on the EUP slot.  B is a small static constant -> unrolled.
    a_bs = []
    for b in range(B):
        ab = a[:, b * N:(b + 1) * N]                             # (C, N)
        ss = jnp.sum(ab * ab, axis=1, keepdims=True)             # (C, 1)
        inv = pl.reciprocal(jnp.sqrt(ss) + 1e-6, approx=True)    # 1/(||a||+eps)
        a_bs.append(ab * inv)

    # Hebbian update: one matmul with contraction depth B*C.
    a_cat = jnp.concatenate(a_bs, axis=0)                        # (B*C, N)
    delta = jax.lax.dot_general(
        a_cat, a_cat, (((0,), (0,)), ((), ())),
        preferred_element_type=jnp.float32)                      # (N, N)
    # delta = 0.001 * (mean over channels of the batch-summed outer products)
    new_lat = jnp.clip(lat_ref[...] + (0.001 / C) * delta[None, :, :],
                       -1.0, 1.0)
    lat_out_ref[...] = new_lat

    # lateral[c, b, j] = sum_i act[c, b, i] * new_lat[c, i, j]  (batched on c)
    act3 = jnp.stack(a_bs, axis=1)                               # (C, B, N)
    lateral = jax.lax.dot_general(
        act3, new_lat, (((2,), (1,)), ((0,), (0,))),
        preferred_element_type=jnp.float32)                      # (C, B, N)
    lateral = lateral - jnp.mean(lateral, axis=2, keepdims=True)
    out3 = act3 + lateral                                        # (C, B, N)
    for b in range(B):
        act_out_ref[:, b * N:(b + 1) * N] = out3[:, b, :]


def _im2col_flat(x, h_out, w_out):
    """x: (B, C_in, H, W) NCHW; 3x3 conv, stride 2, pad 1.
    Returns (K, B*N): rows ordered (c_in, kh, kw), columns ordered (b, n)."""
    B, Cin, H, W = x.shape
    xp = jnp.pad(x, ((0, 0), (0, 0), (1, 1), (1, 1)))
    cols = []
    for kh in range(3):
        for kw in range(3):
            cols.append(xp[:, :, kh:kh + 2 * h_out:2, kw:kw + 2 * w_out:2])
    patches = jnp.stack(cols, axis=2)                     # (B, Cin, 9, h, w)
    patches = patches.reshape(B, Cin * 9, h_out * w_out)  # (B, K, N)
    return patches.transpose(1, 0, 2).reshape(Cin * 9, B * h_out * w_out)


def hebbian_layer_forward(x, conv_w, conv_b, lat):
    """One HebbianEncoder layer.  x: (B, C_in, H, W) float32.
    Returns (act (B, C_out, H_out, W_out), updated lateral weights)."""
    B, Cin, H, W = x.shape
    Cout = conv_w.shape[0]
    h_out = (H - 1) // 2 + 1
    w_out = (W - 1) // 2 + 1
    N = h_out * w_out

    patches = _im2col_flat(x, h_out, w_out)               # (K, B*N) lane-dense
    w_mat = conv_w.reshape(Cout, Cin * 9)                 # (C, K)
    b_col = conv_b.reshape(Cout, 1)                       # (C, 1)

    act_flat, new_lat = pl.pallas_call(
        hebbian_layer_kernel,
        out_shape=(
            jax.ShapeDtypeStruct((Cout, B * N), jnp.float32),   # lane-dense act
            jax.ShapeDtypeStruct((Cout, N, N), jnp.float32),    # updated lat
        ),
        in_specs=[pl.BlockSpec(memory_space=pltpu.MemorySpace.VMEM)] * 4,
        out_specs=(
            pl.BlockSpec(memory_space=pltpu.MemorySpace.VMEM),
            pl.BlockSpec(memory_space=pltpu.MemorySpace.VMEM),
        ),
        input_output_aliases={3: 1},   # lat input reuses the lat_out HBM buffer
    )(w_mat, b_col, patches, lat)

    # (C, B*N) -> (B, C, H_out, W_out) for the next layer / final flatten.
    act = act_flat.reshape(Cout, B, N).transpose(1, 0, 2).reshape(
        B, Cout, h_out, w_out)
    return act, new_lat


@jax.jit
def multi_layer_hebbian_forward(x, params):
    """params: list of (conv_w, conv_b, lateral_weights) per layer.
    Returns flattened features (B, -1) and the updated lateral weights
    (the PyTorch module mutates them in-place; here we return them)."""
    new_lats = []
    for (w, b, lat) in params:
        x, nl = hebbian_layer_forward(x, w, b, lat)
        new_lats.append(nl)
    # TODO(synk): the PyTorch step-logging print has no kernel equivalent; omitted.
    return x.reshape(x.shape[0], -1), new_lats


# ------------------------- pure-JAX reference -------------------------------
def _reference_layer(x, w, b, lat):
    act = jax.lax.conv_general_dilated(
        x, w, window_strides=(2, 2), padding=((1, 1), (1, 1)),
        dimension_numbers=('NCHW', 'OIHW', 'NCHW'))
    act = jax.nn.relu(act + b.reshape(1, -1, 1, 1))
    nrm = jnp.sqrt(jnp.sum(act * act, axis=(2, 3), keepdims=True))
    act = act / (nrm + 1e-6)
    B, C, H, W = act.shape
    af = act.reshape(B, C, H * W)
    heb = jnp.einsum('bni,bnj->nij', af, af)
    delta = 0.001 * heb.mean(axis=0)
    new_lat = jnp.clip(lat + delta, -1.0, 1.0)
    lateral = jnp.einsum('bci,cij->bcj', af, new_lat).reshape(B, C, H, W)
    lateral = lateral - lateral.mean(axis=(2, 3), keepdims=True)
    return act + lateral, new_lat


if __name__ == "__main__":
    key = jax.random.PRNGKey(0)
    B = 2
    # layer_shapes = [(in_c, out_c, output_spatial)] — 16x16 input -> 8x8 -> 4x4
    layer_shapes = [(4, 8, (8, 8)), (8, 16, (4, 4))]
    x = jax.random.normal(key, (B, 4, 16, 16), dtype=jnp.float32)

    params = []
    for idx, (cin, cout, spatial) in enumerate(layer_shapes):
        kw_, kb_ = jax.random.split(jax.random.fold_in(key, idx + 1))
        fan_in = cin * 9
        bound = 1.0 / (fan_in ** 0.5)
        conv_w = jax.random.uniform(kw_, (cout, cin, 3, 3), jnp.float32,
                                    -bound, bound)
        conv_b = jax.random.uniform(kb_, (cout,), jnp.float32, -bound, bound)
        N = spatial[0] * spatial[1]
        lat = jnp.zeros((cout, N, N), jnp.float32)   # matches torch.zeros init
        params.append((conv_w, conv_b, lat))

    out, new_lats = multi_layer_hebbian_forward(x, params)
    out = jax.block_until_ready(out)

    # sanity check against a pure-JAX reference
    xr = x
    for (w, b, lat) in params:
        xr, _ = _reference_layer(xr, w, b, lat)
    ref = xr.reshape(B, -1)
    assert out.shape == ref.shape == (B, 16 * 4 * 4)
    assert float(jnp.max(jnp.abs(out - ref))) < 5e-3

    print("KERNEL_OK")
</pallas_src>

<mosaic_0001>
module attributes {stable_mosaic.version = 11 : i64} {
  func.func @hebbian_layer_kernel(%arg0: memref<8x36xf32, #tpu.memory_space<vmem>>, %arg1: memref<8x1xf32, #tpu.memory_space<vmem>>, %arg2: memref<36x128xf32, #tpu.memory_space<vmem>>, %arg3: memref<8x64x64xf32, #tpu.memory_space<vmem>>, %arg4: memref<8x128xf32, #tpu.memory_space<vmem>>, %arg5: memref<8x64x64xf32, #tpu.memory_space<vmem>>) attributes {dimension_semantics = [], scalar_prefetch = 0 : i64, scratch_operands = 0 : i64, tpu.core_type = #tpu.core_type<tc>} {
    %c0 = arith.constant 0 : index
    %c0_0 = arith.constant 0 : index
    %0 = vector.load %arg0[%c0, %c0_0] : memref<8x36xf32, #tpu.memory_space<vmem>>, vector<8x36xf32>
    %c0_1 = arith.constant 0 : index
    %c0_2 = arith.constant 0 : index
    %1 = vector.load %arg2[%c0_1, %c0_2] : memref<36x128xf32, #tpu.memory_space<vmem>>, vector<36x128xf32>
    %cst = arith.constant dense<0.000000e+00> : vector<8x128xf32>
    %2 = tpu.matmul %0, %1, %cst {dimension_numbers = #tpu.dot_dimension_numbers<[1], [0], [0], [1], [0, 0, 1, 1], [], []>} : vector<8x36xf32>, vector<36x128xf32>, vector<8x128xf32> -> vector<8x128xf32>
    %c0_3 = arith.constant 0 : index
    %c0_4 = arith.constant 0 : index
    %3 = vector.load %arg1[%c0_3, %c0_4] : memref<8x1xf32, #tpu.memory_space<vmem>>, vector<8x1xf32>
    %4 = vector.broadcast %3 : vector<8x1xf32> to vector<8x128xf32>
    %5 = arith.addf %2, %4 : vector<8x128xf32>
    %cst_5 = arith.constant 0.000000e+00 : f32
    %6 = vector.broadcast %cst_5 : f32 to vector<8x128xf32>
    %7 = arith.maximumf %5, %6 : vector<8x128xf32>
    %8 = vector.extract_strided_slice %7 {offsets = [0, 0], sizes = [8, 64], strides = [1, 1]} : vector<8x128xf32> to vector<8x64xf32>
    %9 = arith.mulf %8, %8 : vector<8x64xf32>
    %cst_6 = arith.constant dense<0.000000e+00> : vector<8xf32>
    %10 = vector.multi_reduction <add>, %9, %cst_6 [1] : vector<8x64xf32> to vector<8xf32>
    %11 = vector.shape_cast %10 : vector<8xf32> to vector<8x1xf32>
    %12 = math.sqrt %11 : vector<8x1xf32>
    %cst_7 = arith.constant 9.99999997E-7 : f32
    %13 = vector.broadcast %cst_7 : f32 to vector<8x1xf32>
    %14 = arith.addf %12, %13 : vector<8x1xf32>
    %15 = tpu.reciprocal %14 {approx = true} : vector<8x1xf32> -> vector<8x1xf32>
    %16 = vector.broadcast %15 : vector<8x1xf32> to vector<8x64xf32>
    %17 = arith.mulf %8, %16 : vector<8x64xf32>
    %18 = vector.extract_strided_slice %7 {offsets = [0, 64], sizes = [8, 64], strides = [1, 1]} : vector<8x128xf32> to vector<8x64xf32>
    %19 = arith.mulf %18, %18 : vector<8x64xf32>
    %cst_8 = arith.constant dense<0.000000e+00> : vector<8xf32>
    %20 = vector.multi_reduction <add>, %19, %cst_8 [1] : vector<8x64xf32> to vector<8xf32>
    %21 = vector.shape_cast %20 : vector<8xf32> to vector<8x1xf32>
    %22 = math.sqrt %21 : vector<8x1xf32>
    %cst_9 = arith.constant 9.99999997E-7 : f32
    %23 = vector.broadcast %cst_9 : f32 to vector<8x1xf32>
    %24 = arith.addf %22, %23 : vector<8x1xf32>
    %25 = tpu.reciprocal %24 {approx = true} : vector<8x1xf32> -> vector<8x1xf32>
    %26 = vector.broadcast %25 : vector<8x1xf32> to vector<8x64xf32>
    %27 = arith.mulf %18, %26 : vector<8x64xf32>
    %28 = tpu.concatenate %17, %27 in 0 : vector<8x64xf32>, vector<8x64xf32> -> vector<16x64xf32>
    %cst_10 = arith.constant dense<0.000000e+00> : vector<64x64xf32>
    %29 = tpu.matmul %28, %28, %cst_10 {dimension_numbers = #tpu.dot_dimension_numbers<[0], [0], [1], [1], [0, 1, 1, 1], [], []>} : vector<16x64xf32>, vector<16x64xf32>, vector<64x64xf32> -> vector<64x64xf32>
    %c0_11 = arith.constant 0 : index
    %c0_12 = arith.constant 0 : index
    %c0_13 = arith.constant 0 : index
    %30 = vector.load %arg3[%c0_11, %c0_12, %c0_13] : memref<8x64x64xf32, #tpu.memory_space<vmem>>, vector<8x64x64xf32>
    %31 = vector.shape_cast %29 : vector<64x64xf32> to vector<1x64x64xf32>
    %cst_14 = arith.constant 1.250000e-04 : f32
    %32 = vector.broadcast %cst_14 : f32 to vector<1x64x64xf32>
    %33 = arith.mulf %32, %31 : vector<1x64x64xf32>
    %34 = vector.broadcast %33 : vector<1x64x64xf32> to vector<8x64x64xf32>
    %35 = arith.addf %30, %34 : vector<8x64x64xf32>
    %cst_15 = arith.constant -1.000000e+00 : f32
    %cst_16 = arith.constant 1.000000e+00 : f32
    %36 = vector.broadcast %cst_15 : f32 to vector<8x64x64xf32>
    %37 = arith.maximumf %36, %35 : vector<8x64x64xf32>
    %38 = vector.broadcast %cst_16 : f32 to vector<8x64x64xf32>
    %39 = arith.minimumf %38, %37 : vector<8x64x64xf32>
    %c0_17 = arith.constant 0 : index
    %c0_18 = arith.constant 0 : index
    %c0_19 = arith.constant 0 : index
    %40 = vector.load %arg5[%c0_17, %c0_18, %c0_19] : memref<8x64x64xf32, #tpu.memory_space<vmem>>, vector<8x64x64xf32>
    tpu.vector_store %arg5[%c0_17, %c0_18, %c0_19], %39 {strides = array<i32>} : memref<8x64x64xf32, #tpu.memory_space<vmem>>, vector<8x64x64xf32>,
    %41 = vector.shape_cast %17 : vector<8x64xf32> to vector<8x1x64xf32>
    %42 = vector.shape_cast %27 : vector<8x64xf32> to vector<8x1x64xf32>
    %43 = tpu.concatenate %41, %42 in 1 : vector<8x1x64xf32>, vector<8x1x64xf32> -> vector<8x2x64xf32>
    %cst_20 = arith.constant dense<0.000000e+00> : vector<8x2x64xf32>
    %44 = tpu.matmul %43, %39, %cst_20 {dimension_numbers = #tpu.dot_dimension_numbers<[2], [1], [1], [2], [0, 0, 0, 1, 1, 2], [0], [0]>} : vector<8x2x64xf32>, vector<8x64x64xf32>, vector<8x2x64xf32> -> vector<8x2x64xf32>
    %cst_21 = arith.constant dense<0.000000e+00> : vector<8x2xf32>
    %45 = vector.multi_reduction <add>, %44, %cst_21 [2] : vector<8x2x64xf32> to vector<8x2xf32>
    %46 = vector.shape_cast %45 : vector<8x2xf32> to vector<8x2x1xf32>
    %cst_22 = arith.constant 6.400000e+01 : f32
    %47 = vector.broadcast %cst_22 : f32 to vector<8x2x1xf32>
    %48 = arith.divf %46, %47 : vector<8x2x1xf32>
    %49 = vector.broadcast %48 : vector<8x2x1xf32> to vector<8x2x64xf32>
    %50 = arith.subf %44, %49 : vector<8x2x64xf32>
    %51 = arith.addf %43, %50 : vector<8x2x64xf32>
    %52 = vector.extract_strided_slice %51 {offsets = [0, 0, 0], sizes = [8, 1, 64], strides = [1, 1, 1]} : vector<8x2x64xf32> to vector<8x1x64xf32>
    %53 = vector.shape_cast %52 : vector<8x1x64xf32> to vector<8x64xf32>
    %c0_23 = arith.constant 0 : index
    %c0_24 = arith.constant 0 : index
    %54 = vector.load %arg4[%c0_23, %c0_24] : memref<8x128xf32, #tpu.memory_space<vmem>>, vector<8x64xf32>
    tpu.vector_store %arg4[%c0_23, %c0_24], %53 {strides = array<i32>} : memref<8x128xf32, #tpu.memory_space<vmem>>, vector<8x64xf32>,
    %55 = vector.extract_strided_slice %51 {offsets = [0, 1, 0], sizes = [8, 1, 64], strides = [1, 1, 1]} : vector<8x2x64xf32> to vector<8x1x64xf32>
    %56 = vector.shape_cast %55 : vector<8x1x64xf32> to vector<8x64xf32>
    %c0_25 = arith.constant 0 : index
    %c64 = arith.constant 64 : index
    %57 = vector.load %arg4[%c0_25, %c64] : memref<8x128xf32, #tpu.memory_space<vmem>>, vector<8x64xf32>
    tpu.vector_store %arg4[%c0_25, %c64], %56 {strides = array<i32>} : memref<8x128xf32, #tpu.memory_space<vmem>>, vector<8x64xf32>,
    return
  }
}

module attributes {stable_mosaic.version = 11 : i64} {
  func.func @hebbian_layer_kernel(%arg0: memref<16x72xf32, #tpu.memory_space<vmem>>, %arg1: memref<16x1xf32, #tpu.memory_space<vmem>>, %arg2: memref<72x32xf32, #tpu.memory_space<vmem>>, %arg3: memref<16x16x16xf32, #tpu.memory_space<vmem>>, %arg4: memref<16x32xf32, #tpu.memory_space<vmem>>, %arg5: memref<16x16x16xf32, #tpu.memory_space<vmem>>) attributes {dimension_semantics = [], scalar_prefetch = 0 : i64, scratch_operands = 0 : i64, tpu.core_type = #tpu.core_type<tc>} {
    %c0 = arith.constant 0 : index
    %c0_0 = arith.constant 0 : index
    %0 = vector.load %arg0[%c0, %c0_0] : memref<16x72xf32, #tpu.memory_space<vmem>>, vector<16x72xf32>
    %c0_1 = arith.constant 0 : index
    %c0_2 = arith.constant 0 : index
    %1 = vector.load %arg2[%c0_1, %c0_2] : memref<72x32xf32, #tpu.memory_space<vmem>>, vector<72x32xf32>
    %cst = arith.constant dense<0.000000e+00> : vector<16x32xf32>
    %2 = tpu.matmul %0, %1, %cst {dimension_numbers = #tpu.dot_dimension_numbers<[1], [0], [0], [1], [0, 0, 1, 1], [], []>} : vector<16x72xf32>, vector<72x32xf32>, vector<16x32xf32> -> vector<16x32xf32>
    %c0_3 = arith.constant 0 : index
    %c0_4 = arith.constant 0 : index
    %3 = vector.load %arg1[%c0_3, %c0_4] : memref<16x1xf32, #tpu.memory_space<vmem>>, vector<16x1xf32>
    %4 = vector.broadcast %3 : vector<16x1xf32> to vector<16x32xf32>
    %5 = arith.addf %2, %4 : vector<16x32xf32>
    %cst_5 = arith.constant 0.000000e+00 : f32
    %6 = vector.broadcast %cst_5 : f32 to vector<16x32xf32>
    %7 = arith.maximumf %5, %6 : vector<16x32xf32>
    %8 = vector.extract_strided_slice %7 {offsets = [0, 0], sizes = [16, 16], strides = [1, 1]} : vector<16x32xf32> to vector<16x16xf32>
    %9 = arith.mulf %8, %8 : vector<16x16xf32>
    %cst_6 = arith.constant dense<0.000000e+00> : vector<16xf32>
    %10 = vector.multi_reduction <add>, %9, %cst_6 [1] : vector<16x16xf32> to vector<16xf32>
    %11 = vector.shape_cast %10 : vector<16xf32> to vector<16x1xf32>
    %12 = math.sqrt %11 : vector<16x1xf32>
    %cst_7 = arith.constant 9.99999997E-7 : f32
    %13 = vector.broadcast %cst_7 : f32 to vector<16x1xf32>
    %14 = arith.addf %12, %13 : vector<16x1xf32>
    %15 = tpu.reciprocal %14 {approx = true} : vector<16x1xf32> -> vector<16x1xf32>
    %16 = vector.broadcast %15 : vector<16x1xf32> to vector<16x16xf32>
    %17 = arith.mulf %8, %16 : vector<16x16xf32>
    %18 = vector.extract_strided_slice %7 {offsets = [0, 16], sizes = [16, 16], strides = [1, 1]} : vector<16x32xf32> to vector<16x16xf32>
    %19 = arith.mulf %18, %18 : vector<16x16xf32>
    %cst_8 = arith.constant dense<0.000000e+00> : vector<16xf32>
    %20 = vector.multi_reduction <add>, %19, %cst_8 [1] : vector<16x16xf32> to vector<16xf32>
    %21 = vector.shape_cast %20 : vector<16xf32> to vector<16x1xf32>
    %22 = math.sqrt %21 : vector<16x1xf32>
    %cst_9 = arith.constant 9.99999997E-7 : f32
    %23 = vector.broadcast %cst_9 : f32 to vector<16x1xf32>
    %24 = arith.addf %22, %23 : vector<16x1xf32>
    %25 = tpu.reciprocal %24 {approx = true} : vector<16x1xf32> -> vector<16x1xf32>
    %26 = vector.broadcast %25 : vector<16x1xf32> to vector<16x16xf32>
    %27 = arith.mulf %18, %26 : vector<16x16xf32>
    %28 = tpu.concatenate %17, %27 in 0 : vector<16x16xf32>, vector<16x16xf32> -> vector<32x16xf32>
    %cst_10 = arith.constant dense<0.000000e+00> : vector<16x16xf32>
    %29 = tpu.matmul %28, %28, %cst_10 {dimension_numbers = #tpu.dot_dimension_numbers<[0], [0], [1], [1], [0, 1, 1, 1], [], []>} : vector<32x16xf32>, vector<32x16xf32>, vector<16x16xf32> -> vector<16x16xf32>
    %c0_11 = arith.constant 0 : index
    %c0_12 = arith.constant 0 : index
    %c0_13 = arith.constant 0 : index
    %30 = vector.load %arg3[%c0_11, %c0_12, %c0_13] : memref<16x16x16xf32, #tpu.memory_space<vmem>>, vector<16x16x16xf32>
    %31 = vector.shape_cast %29 : vector<16x16xf32> to vector<1x16x16xf32>
    %cst_14 = arith.constant 6.250000e-05 : f32
    %32 = vector.broadcast %cst_14 : f32 to vector<1x16x16xf32>
    %33 = arith.mulf %32, %31 : vector<1x16x16xf32>
    %34 = vector.broadcast %33 : vector<1x16x16xf32> to vector<16x16x16xf32>
    %35 = arith.addf %30, %34 : vector<16x16x16xf32>
    %cst_15 = arith.constant -1.000000e+00 : f32
    %cst_16 = arith.constant 1.000000e+00 : f32
    %36 = vector.broadcast %cst_15 : f32 to vector<16x16x16xf32>
    %37 = arith.maximumf %36, %35 : vector<16x16x16xf32>
    %38 = vector.broadcast %cst_16 : f32 to vector<16x16x16xf32>
    %39 = arith.minimumf %38, %37 : vector<16x16x16xf32>
    %c0_17 = arith.constant 0 : index
    %c0_18 = arith.constant 0 : index
    %c0_19 = arith.constant 0 : index
    %40 = vector.load %arg5[%c0_17, %c0_18, %c0_19] : memref<16x16x16xf32, #tpu.memory_space<vmem>>, vector<16x16x16xf32>
    tpu.vector_store %arg5[%c0_17, %c0_18, %c0_19], %39 {strides = array<i32>} : memref<16x16x16xf32, #tpu.memory_space<vmem>>, vector<16x16x16xf32>,
    %41 = vector.shape_cast %17 : vector<16x16xf32> to vector<16x1x16xf32>
    %42 = vector.shape_cast %27 : vector<16x16xf32> to vector<16x1x16xf32>
    %43 = tpu.concatenate %41, %42 in 1 : vector<16x1x16xf32>, vector<16x1x16xf32> -> vector<16x2x16xf32>
    %cst_20 = arith.constant dense<0.000000e+00> : vector<16x2x16xf32>
    %44 = tpu.matmul %43, %39, %cst_20 {dimension_numbers = #tpu.dot_dimension_numbers<[2], [1], [1], [2], [0, 0, 0, 1, 1, 2], [0], [0]>} : vector<16x2x16xf32>, vector<16x16x16xf32>, vector<16x2x16xf32> -> vector<16x2x16xf32>
    %cst_21 = arith.constant dense<0.000000e+00> : vector<16x2xf32>
    %45 = vector.multi_reduction <add>, %44, %cst_21 [2] : vector<16x2x16xf32> to vector<16x2xf32>
    %46 = vector.shape_cast %45 : vector<16x2xf32> to vector<16x2x1xf32>
    %cst_22 = arith.constant 1.600000e+01 : f32
    %47 = vector.broadcast %cst_22 : f32 to vector<16x2x1xf32>
    %48 = arith.divf %46, %47 : vector<16x2x1xf32>
    %49 = vector.broadcast %48 : vector<16x2x1xf32> to vector<16x2x16xf32>
    %50 = arith.subf %44, %49 : vector<16x2x16xf32>
    %51 = arith.addf %43, %50 : vector<16x2x16xf32>
    %52 = vector.extract_strided_slice %51 {offsets = [0, 0, 0], sizes = [16, 1, 16], strides = [1, 1, 1]} : vector<16x2x16xf32> to vector<16x1x16xf32>
    %53 = vector.shape_cast %52 : vector<16x1x16xf32> to vector<16x16xf32>
    %c0_23 = arith.constant 0 : index
    %c0_24 = arith.constant 0 : index
    %54 = vector.load %arg4[%c0_23, %c0_24] : memref<16x32xf32, #tpu.memory_space<vmem>>, vector<16x16xf32>
    tpu.vector_store %arg4[%c0_23, %c0_24], %53 {strides = array<i32>} : memref<16x32xf32, #tpu.memory_space<vmem>>, vector<16x16xf32>,
    %55 = vector.extract_strided_slice %51 {offsets = [0, 1, 0], sizes = [16, 1, 16], strides = [1, 1, 1]} : vector<16x2x16xf32> to vector<16x1x16xf32>
    %56 = vector.shape_cast %55 : vector<16x1x16xf32> to vector<16x16xf32>
    %c0_25 = arith.constant 0 : index
    %c16 = arith.constant 16 : index
    %57 = vector.load %arg4[%c0_25, %c16] : memref<16x32xf32, #tpu.memory_space<vmem>>, vector<16x16xf32>
    tpu.vector_store %arg4[%c0_25, %c16], %56 {strides = array<i32>} : memref<16x32xf32, #tpu.memory_space<vmem>>, vector<16x16xf32>,
    return
  }
}

</mosaic_0001>

<bundles_post_ra>
// kernel: multi_layer_hebbian_forward.2
= control target key start
LH: loop header
LB: loop body
LE: loop exit
PB: predicated region body
PF: predicated region fallthrough
CT: control target
= control target key end

     0   :  { %vm35_vm0 = vcmask 1043456   ;;  %v987_v2 = vmov 0   ;;  %vm31_vm1 = vcmask 293888   ;;  %vm61_vm2 = vcmask 523264   ;;  %s1995_s2 = inlined_call_operand.vmem [shape: f32[36,128], index: 2, kind: input, shape index: {}]   ;;  %s1996_s1 = inlined_call_operand.vmem [shape: f32[8,1], index: 1, kind: input, shape index: {}]   ;;  %s1997_s0 = inlined_call_operand.vmem [shape: f32[8,36], index: 0, kind: input, shape index: {}]   ;;  %s1998_s3 = inlined_call_operand.vmem [shape: f32[8,64,64], index: 3, kind: input, shape index: {}, may-alias: {3,5}]   ;;  %s1999_s5 = inlined_call_operand.vmem [shape: f32[8,64,64], index: 5, kind: output, shape index: {1}, may-alias: {3,5}]   ;;  %s2000_s4 = inlined_call_operand.vmem [shape: f32[8,128], index: 4, kind: output, shape index: {0}]  }
   0x1   :  { %v24_v0 = vld [vmem:[%s1995_s2 + $0x20] sm:$0xf]  ;;  %v23_v1 = vld [vmem:[%s1995_s2 + $0x18] sm:$0xff]  ;;  %976 = vset.pattern.permute.xlu0 %v987_v2  ;;  %v22_v3 = vld [vmem:[%s1995_s2 + $0x10] sm:$0xff]  ;;  %vm138_vm7 = vcmask 130048   ;;  %vm586_vm8 = vcmask 1040384  }
   0x2   :  { %890 = vmatpush.msk.msra.mxu0 %vm35_vm0, %v24_v0  ;;  %v25_v4 = vld [vmem:[%s1996_s1] sm:$0xff]  ;;  %v21_v5 = vld [vmem:[%s1995_s2 + $0x8] sm:$0xff]  ;;  %s988_s1 = smov 64   ;;  %vm779_vm9 = vcmask 517120   ;;  %vm844_vm11 = vcmask 1041409   ;;  %vm847_vm12 = vcmask 1042434  }
   0x3   :  { %28 = vperm.xlu0 %976, %v25_v4   ;;  %v20_v6 = vld [vmem:[%s1995_s2] sm:$0xff]  ;;  %vm850_vm13 = vcmask 1043459   ;;  %vm853_vm14 = vcmask 1044484   ;;  %vm856_vm15 = vcmask 1045509   ;;  %vm859_vm0 = vcmask 1046534  }
   0x4   :  { %51 = vmatpush.msra.mxu0 %v23_v1  ;;  %v19_v7 = vld [vmem:[%s1997_s0] sm:$0xff] }
   0x5   :  { %v204_v4 = vld [vmem:[%s1998_s3] sm:$0xff] }
   0x6   :  { %52 = vmatpush.msra.mxu0 %v22_v3 }
   0x8   :  { %53 = vmatpush.msra.mxu0 %v21_v5 }
   0xa   :  { %54 = vmatpush.msra.mxu0 %v20_v6  ;;  %v212_v6 = vld [vmem:[%s1998_s3 + $0x40] sm:$0xff] }
   0xb   :  { %891 = vmatmul.msk.f32.vlgmr.msra.gmra.mxu0 %vm31_vm1, %v19_v7  ;;  %v220_v7 = vld [vmem:[%s1998_s3 + $0x80] sm:$0xff]  ;;  %vm862_vm1 = vcmask 1047559  }
  0x75   :  { %v29_v8 = vpop.permute.xlu0 %28 }
  0x88   :  { %v56_v9 = vpop.f32.mrf.mxu0 }
  0x89   :  { %v57_v10 = vadd.f32 %v56_v9, %v29_v8  ;;  %v228_v8 = vld [vmem:[%s1998_s3 + $0xc0] sm:$0xff] }
  0x8b   :  { %v1041_v11 = vmax.f32 %v57_v10, 0.0  ;;  %v236_v10 = vld [vmem:[%s1998_s3 + $0x100] sm:$0xff] }
  0x8d   :  { %v60_v12 = vmul.f32 %v1041_v11, %v1041_v11 }
  0x8f   :  { %81 = vrot.lane.b32.xlu0 %v60_v12, %s988_s1  ;;  %v62_v15 = vsel %vm61_vm2, %v60_v12, 0.0  ;;  %v252_v12 = vld [vmem:[%s1998_s3 + $0x180] sm:$0xff] }
 0x101   :  { %v82_v13 = vpop.permute.xlu0 %81 }
 0x102   :  { %v84_v14 = vsel %vm61_vm2, %v82_v13, 0.0 }
 0x103   :  { %85 = vadd.xlane.f32.xlu1 %v84_v14 }
 0x10b   :  { %63 = vadd.xlane.f32.xlu1 %v62_v15 }
 0x176   :  { %v86_v16 = vpop.xlane.xlu1 %85 }
 0x177   :  { %977 = vrsqrt.f32 %v86_v16  ;;  %vm94_vm3 = vcmp.eq.f32.partialorder %v86_v16, inf  ;;  %v97_v25 = vand.u32 2147483648, %v86_v16  ;;  %vm96_vm4 = vcmp.eq.f32.partialorder %v86_v16, 0.0 }
 0x17d   :  { %v978_v17 = vpop.eup %977 }
 0x17e   :  { %v88_v18 = vmul.f32 %v978_v17, %v86_v16  ;;  %v64_v22 = vpop.xlane.xlu1 %63 }
 0x17f   :  { %979 = vrsqrt.f32 %v64_v22  ;;  %vm72_vm5 = vcmp.eq.f32.partialorder %v64_v22, inf  ;;  %v75_v49 = vand.u32 2147483648, %v64_v22  ;;  %vm74_vm6 = vcmp.eq.f32.partialorder %v64_v22, 0.0 }
 0x180   :  { %v89_v19 = vmul.f32 %v978_v17, %v88_v18 }
 0x182   :  { %v90_v20 = vmul.f32 0.5, %v89_v19 }
 0x184   :  { %v91_v21 = vsub.f32 1.5, %v90_v20 }
 0x185   :  { %v980_v29 = vpop.eup %979 }
 0x186   :  { %v92_v23 = vmul.f32 %v978_v17, %v91_v21  ;;  %v66_v30 = vmul.f32 %v980_v29, %v64_v22  ;;  %v260_v17 = vld [vmem:[%s1998_s3 + $0x1c0] sm:$0xff] }
 0x188   :  { %v93_v24 = vmul.f32 %v92_v23, %v86_v16  ;;  %v67_v32 = vmul.f32 %v980_v29, %v66_v30 }
 0x18a   :  { %v95_v26 = vsel %vm94_vm3, %v86_v16, %v93_v24  ;;  %v68_v36 = vmul.f32 0.5, %v67_v32  ;;  %vm880_vm3 = vcmask 1040896  }
 0x18b   :  { %v98_v27 = vsel %vm96_vm4, %v97_v25, %v95_v26  ;;  %v205_v26 = vld [vmem:[%s1998_s3 + $0x8] sm:$0xff]  ;;  %vm878_vm4 = vcmask 1048065  }
 0x18c   :  { %v99_v28 = vadd.f32 1e-06, %v98_v27  ;;  %v69_v39 = vsub.f32 1.5, %v68_v36 }
 0x18e   :  { %981 = vrcp.f32 %v99_v28  ;;  %v70_v42 = vmul.f32 %v980_v29, %v69_v39 }
 0x190   :  { %v71_v45 = vmul.f32 %v70_v42, %v64_v22 }
 0x192   :  { %v73_v48 = vsel %vm72_vm5, %v64_v22, %v71_v45 }
 0x193   :  { %v76_v51 = vsel %vm74_vm6, %v75_v49, %v73_v48 }
 0x194   :  { %v982_v31 = vpop.eup %981  ;;  %v77_v53 = vadd.f32 1e-06, %v76_v51 }
 0x195   :  { %v101_v33 = vmul.f32 %v982_v31, %v1041_v11 }
 0x196   :  { %983 = vrcp.f32 %v77_v53 }
 0x197   :  { %103 = vrot.lane.b32.xlu2 %v101_v33, %s988_s1  ;;  %v554_v34 = vperm.slane %v101_v33, 0  ;;  %v547_v35 = vrot.slane %v101_v33, 1  ;;  %v549_v38 = vrot.slane %v101_v33, 3  ;;  %v552_v40 = vrot.slane %v101_v33, 6 }
 0x198   :  { %v550_v44 = vrot.slane %v101_v33, 4  ;;  %v551_v46 = vrot.slane %v101_v33, 5  ;;  %v548_v52 = vrot.slane %v101_v33, 2  ;;  %v553_v55 = vrot.slane %v101_v33, 7 }
 0x199   :  { %562 = vrot.lane.b32.xlu0 %v554_v34, %s988_s1  ;;  %v555_v37 = vperm.slane %v547_v35, 0  ;;  %v557_v41 = vperm.slane %v549_v38, 0  ;;  %v560_v43 = vperm.slane %v552_v40, 0 }
 0x19a   :  { %v558_v47 = vperm.slane %v550_v44, 0  ;;  %v559_v50 = vperm.slane %v551_v46, 0  ;;  %v556_v54 = vperm.slane %v548_v52, 0  ;;  %v561_v56 = vperm.slane %v553_v55, 0 }
 0x19b   :  { %564 = vrot.lane.b32.xlu1 %v555_v37, %s988_s1 }
 0x19c   :  { %v984_v57 = vpop.eup %983 }
 0x19d   :  { %v1059_v58 = vmul.f32 %v984_v57, %v1041_v11  ;;  %v244_v11 = vld [vmem:[%s1998_s3 + $0x140] sm:$0xff] }
 0x1a1   :  { %568 = vrot.lane.b32.xlu0 %v557_v41, %s988_s1 }
 0x1a3   :  { %574 = vrot.lane.b32.xlu1 %v560_v43, %s988_s1 }
 0x1a9   :  { %570 = vrot.lane.b32.xlu0 %v558_v47, %s988_s1 }
 0x1ab   :  { %572 = vrot.lane.b32.xlu1 %v559_v50, %s988_s1 }
 0x1b1   :  { %566 = vrot.lane.b32.xlu0 %v556_v54, %s988_s1 }
 0x1b9   :  { %576 = vrot.lane.b32.xlu0 %v561_v56, %s988_s1 }
 0x1bd   :  { %106 = vxpose.xlu2.b32.start [1/2] (short) (narrow) %v1059_v58, 64 }
 0x1f1   :  { %v104_v59 = vpop.permute.xlu2 %103 }
 0x1f2   :  { %177 = vmatpush.msra.mxu1 %v104_v59  ;;  %107 = vxpose.xlu2.b32.end [2/2] (short) (narrow) %v104_v59, 64 }
 0x1f4   :  { %178 = vmatpush.msra.mxu1 %v1059_v58 }
 0x283   :  { %v122_v60 = vpop.trf.xlu2 }
 0x284   :  { %892 = vmatmul.msk.f32.vlgmr.msra.gmra.mxu1 %vm138_vm7, %v122_v60 }
 0x28b   :  { %v123_v61 = vpop.trf.xlu2 }
 0x28c   :  { %893 = vmatmul.msk.f32.gmra.mxu1 %vm138_vm7, %v123_v61 }
 0x293   :  { %v124_v62 = vpop.trf.xlu2 }
 0x294   :  { %894 = vmatmul.msk.f32.gmra.mxu1 %vm138_vm7, %v124_v62 }
 0x29b   :  { %v125_v63 = vpop.trf.xlu2 }
 0x29c   :  { %895 = vmatmul.msk.f32.gmra.mxu1 %vm138_vm7, %v125_v63 }
 0x2a3   :  { %v126_v0 = vpop.trf.xlu2 }
 0x2a4   :  { %896 = vmatmul.msk.f32.gmra.mxu1 %vm138_vm7, %v126_v0 }
 0x2ab   :  { %v127_v1 = vpop.trf.xlu2 }
 0x2ac   :  { %897 = vmatmul.msk.f32.gmra.mxu1 %vm138_vm7, %v127_v1 }
 0x2b3   :  { %v128_v2 = vpop.trf.xlu2 }
 0x2b4   :  { %898 = vmatmul.msk.f32.gmra.mxu1 %vm138_vm7, %v128_v2 }
 0x2bb   :  { %v129_v3 = vpop.trf.xlu2 }
 0x2bc   :  { %899 = vmatmul.msk.f32.gmra.mxu1 %vm138_vm7, %v129_v3 }
 0x301   :  { %v180_v5 = vpop.f32.mrf.mxu1 }
 0x302   :  { %v268_v9 = vmul.f32 0.000125, %v180_v5 }
 0x304   :  { %v1092_v13 = vadd.f32 %v268_v9, %v204_v4  ;;  %v1094_v14 = vadd.f32 %v268_v9, %v212_v6  ;;  %v1096_v15 = vadd.f32 %v268_v9, %v220_v7  ;;  %v1098_v16 = vadd.f32 %v268_v9, %v228_v8 }
 0x305   :  { %v1103_v18 = vadd.f32 %v268_v9, %v236_v10  ;;  %v1105_v19 = vadd.f32 %v268_v9, %v244_v11  ;;  %v1110_v23 = vadd.f32 %v268_v9, %v252_v12  ;;  %v1113_v25 = vadd.f32 %v268_v9, %v260_v17 }
 0x306   :  { %v2023_v20 = vclamps-f32 %v1092_v13, 1.0  ;;  %v2022_v21 = vclamps-f32 %v1094_v14, 1.0  ;;  %v2021_v22 = vclamps-f32 %v1096_v15, 1.0  ;;  %v2009_v24 = vclamps-f32 %v1098_v16, 1.0 }
 0x307   :  { %2058 = vst [vmem:[#allocation2_spill] sm:$0xff] %v1105_v19  ;;  %v2008_v27 = vclamps-f32 %v1103_v18, 1.0  ;;  %v2007_v32 = vclamps-f32 %v1105_v19, 1.0  ;;  %v2002_v36 = vclamps-f32 %v1110_v23, 1.0  ;;  %v2001_v38 = vclamps-f32 %v1113_v25, 1.0 }
 0x308   :  { %2059 = vst [vmem:[#allocation3_spill] sm:$0xff] %v1110_v23 }
 0x309   :  { %2060 = vst [vmem:[#allocation4_spill] sm:$0xff] %v1113_v25  ;;  %v183_v28 = vpop.f32.mrf.mxu1 }
 0x30a   :  { %468 = vst.msk [vmem:[%s1999_s5] sm:$0xff] %vm61_vm2, %v2023_v20  ;;  %v269_v33 = vmul.f32 0.000125, %v183_v28 }
 0x30c   :  { %v1164_v39 = vadd.f32 %v269_v33, %v205_v26 }
 0x30e   :  { %v2026_v46 = vclamps-f32 %v1164_v39, 1.0 }
 0x311   :  { %v213_v29 = vld [vmem:[%s1998_s3 + $0x48] sm:$0xff]  ;;  %v186_v54 = vpop.f32.mrf.mxu1 }
 0x312   :  { %v221_v30 = vld [vmem:[%s1998_s3 + $0x88] sm:$0xff]  ;;  %v1166_v40 = vadd.f32 %v269_v33, %v213_v29  ;;  %v270_v60 = vmul.f32 0.000125, %v186_v54 }
 0x313   :  { %476 = vst.msk [vmem:[%s1999_s5 + $0x40] sm:$0xff] %vm61_vm2, %v2022_v21  ;;  %v1168_v41 = vadd.f32 %v269_v33, %v221_v30 }
 0x314   :  { %v2025_v47 = vclamps-f32 %v1166_v40, 1.0 }
 0x315   :  { %v2024_v48 = vclamps-f32 %v1168_v41, 1.0 }
 0x319   :  { %v189_v30 = vpop.f32.mrf.mxu1 }
 0x31a   :  { %v229_v31 = vld [vmem:[%s1998_s3 + $0xc8] sm:$0xff] }
 0x31b   :  { %484 = vst.msk [vmem:[%s1999_s5 + $0x80] sm:$0xff] %vm61_vm2, %v2021_v22  ;;  %v1170_v42 = vadd.f32 %v269_v33, %v229_v31 }
 0x31d   :  { %v2012_v50 = vclamps-f32 %v1170_v42, 1.0 }
 0x322   :  { %v237_v34 = vld [vmem:[%s1998_s3 + $0x108] sm:$0xff] }
 0x323   :  { %v245_v35 = vld [vmem:[%s1998_s3 + $0x148] sm:$0xff]  ;;  %v1181_v44 = vadd.f32 %v269_v33, %v237_v34 }
 0x324   :  { %492 = vst.msk [vmem:[%s1999_s5 + $0xc0] sm:$0xff] %vm61_vm2, %v2009_v24  ;;  %v1183_v45 = vadd.f32 %v269_v33, %v245_v35 }
 0x325   :  { %v2011_v53 = vclamps-f32 %v1181_v44, 1.0 }
 0x326   :  { %v2010_v59 = vclamps-f32 %v1183_v45, 1.0 }
 0x32b   :  { %v253_v37 = vld [vmem:[%s1998_s3 + $0x188] sm:$0xff] }
 0x32c   :  { %500 = vst.msk [vmem:[%s1999_s5 + $0x100] sm:$0xff] %vm61_vm2, %v2008_v27  ;;  %v1194_v49 = vadd.f32 %v269_v33, %v253_v37  ;;  %v271_v37 = vmul.f32 0.000125, %v189_v30 }
 0x32e   :  { %2061 = vst [vmem:[#allocation5_spill] sm:$0xff] %v1194_v49  ;;  %v2004_v63 = vclamps-f32 %v1194_v49, 1.0 }
 0x333   :  { %v261_v43 = vld [vmem:[%s1998_s3 + $0x1c8] sm:$0xff] }
 0x334   :  { %508 = vst.msk [vmem:[%s1999_s5 + $0x140] sm:$0xff] %vm61_vm2, %v2007_v32  ;;  %v1203_v51 = vadd.f32 %v269_v33, %v261_v43 }
 0x335   :  { %516 = vst.msk [vmem:[%s1999_s5 + $0x180] sm:$0xff] %vm61_vm2, %v2002_v36 }
 0x336   :  { %2062 = vst [vmem:[#allocation6_spill] sm:$0xff] %v1203_v51  ;;  %v2003_v1 = vclamps-f32 %v1203_v51, 1.0 }
 0x337   :  { %524 = vst.msk [vmem:[%s1999_s5 + $0x1c0] sm:$0xff] %vm61_vm2, %v2001_v38 }
 0x33e   :  { %v206_v52 = vld [vmem:[%s1998_s3 + $0x10] sm:$0xff] }
 0x33f   :  { %469 = vst.msk [vmem:[%s1999_s5 + $0x8] sm:$0xff] %vm61_vm2, %v2026_v46  ;;  %v1260_v2 = vadd.f32 %v270_v60, %v206_v52 }
 0x341   :  { %v2029_v9 = vclamps-f32 %v1260_v2, 1.0 }
 0x346   :  { %v214_v55 = vld [vmem:[%s1998_s3 + $0x50] sm:$0xff] }
 0x347   :  { %v222_v56 = vld [vmem:[%s1998_s3 + $0x90] sm:$0xff]  ;;  %v1262_v3 = vadd.f32 %v270_v60, %v214_v55 }
 0x348   :  { %477 = vst.msk [vmem:[%s1999_s5 + $0x48] sm:$0xff] %vm61_vm2, %v2025_v47  ;;  %v1264_v4 = vadd.f32 %v270_v60, %v222_v56 }
 0x349   :  { %v2028_v10 = vclamps-f32 %v1262_v3, 1.0 }
 0x34a   :  { %v2027_v11 = vclamps-f32 %v1264_v4, 1.0 }
 0x34f   :  { %v230_v57 = vld [vmem:[%s1998_s3 + $0xd0] sm:$0xff] }
 0x350   :  { %485 = vst.msk [vmem:[%s1999_s5 + $0x88] sm:$0xff] %vm61_vm2, %v2024_v48  ;;  %v1266_v5 = vadd.f32 %v270_v60, %v230_v57 }
 0x352   :  { %v2015_v17 = vclamps-f32 %v1266_v5, 1.0 }
 0x357   :  { %v238_v61 = vld [vmem:[%s1998_s3 + $0x110] sm:$0xff] }
 0x358   :  { %v246_v62 = vld [vmem:[%s1998_s3 + $0x150] sm:$0xff]  ;;  %v1277_v7 = vadd.f32 %v270_v60, %v238_v61 }
 0x359   :  { %493 = vst.msk [vmem:[%s1999_s5 + $0xc8] sm:$0xff] %vm61_vm2, %v2012_v50  ;;  %v1279_v8 = vadd.f32 %v270_v60, %v246_v62 }
 0x35a   :  { %v2014_v29 = vclamps-f32 %v1277_v7, 1.0 }
 0x35b   :  { %v2013_v35 = vclamps-f32 %v1279_v8, 1.0 }
 0x360   :  { %v254_v0 = vld [vmem:[%s1998_s3 + $0x190] sm:$0xff] }
 0x361   :  { %501 = vst.msk [vmem:[%s1999_s5 + $0x108] sm:$0xff] %vm61_vm2, %v2011_v53  ;;  %v1290_v12 = vadd.f32 %v270_v60, %v254_v0 }
 0x363   :  { %2063 = vst [vmem:[#allocation7_spill] sm:$0xff] %v1290_v12  ;;  %v2006_v54 = vclamps-f32 %v1290_v12, 1.0 }
 0x368   :  { %v262_v6 = vld [vmem:[%s1998_s3 + $0x1d0] sm:$0xff] }
 0x369   :  { %509 = vst.msk [vmem:[%s1999_s5 + $0x148] sm:$0xff] %vm61_vm2, %v2010_v59  ;;  %v1299_v26 = vadd.f32 %v270_v60, %v262_v6 }
 0x36a   :  { %517 = vst.msk [vmem:[%s1999_s5 + $0x188] sm:$0xff] %vm61_vm2, %v2004_v63 }
 0x36b   :  { %2064 = vst [vmem:[#allocation8_spill] sm:$0xff] %v1299_v26  ;;  %v2005_v56 = vclamps-f32 %v1299_v26, 1.0 }
 0x36c   :  { %525 = vst.msk [vmem:[%s1999_s5 + $0x1c8] sm:$0xff] %vm61_vm2, %v2003_v1 }
 0x373   :  { %v207_v28 = vld [vmem:[%s1998_s3 + $0x18] sm:$0xff] }
 0x374   :  { %470 = vst.msk [vmem:[%s1999_s5 + $0x10] sm:$0xff] %vm61_vm2, %v2029_v9  ;;  %v1356_v57 = vadd.f32 %v271_v37, %v207_v28 }
 0x376   :  { %v2037_v30 = vclamps-f32 %v1356_v57, 1.0 }
 0x37b   :  { %v215_v31 = vld [vmem:[%s1998_s3 + $0x58] sm:$0xff] }
 0x37c   :  { %v223_v33 = vld [vmem:[%s1998_s3 + $0x98] sm:$0xff]  ;;  %v1358_v60 = vadd.f32 %v271_v37, %v215_v31 }
 0x37d   :  { %478 = vst.msk [vmem:[%s1999_s5 + $0x50] sm:$0xff] %vm61_vm2, %v2028_v10  ;;  %v1360_v61 = vadd.f32 %v271_v37, %v223_v33 }
 0x37e   :  { %v2033_v31 = vclamps-f32 %v1358_v60, 1.0 }
 0x37f   :  { %v2031_v33 = vclamps-f32 %v1360_v61, 1.0 }
 0x384   :  { %v231_v34 = vld [vmem:[%s1998_s3 + $0xd8] sm:$0xff] }
 0x385   :  { %486 = vst.msk [vmem:[%s1999_s5 + $0x90] sm:$0xff] %vm61_vm2, %v2027_v11  ;;  %v1362_v62 = vadd.f32 %v271_v37, %v231_v34 }
 0x38c   :  { %v239_v43 = vld [vmem:[%s1998_s3 + $0x118] sm:$0xff] }
 0x38d   :  { %v247_v52 = vld [vmem:[%s1998_s3 + $0x158] sm:$0xff]  ;;  %v1373_v6 = vadd.f32 %v271_v37, %v239_v43  ;;  %v2020_v43 = vclamps-f32 %v1362_v62, 1.0 }
 0x38e   :  { %494 = vst.msk [vmem:[%s1999_s5 + $0xd0] sm:$0xff] %vm61_vm2, %v2015_v17  ;;  %v1375_v28 = vadd.f32 %v271_v37, %v247_v52 }
 0x390   :  { %v2019_v63 = vclamps-f32 %v1375_v28, 1.0 }
 0x395   :  { %v255_v55 = vld [vmem:[%s1998_s3 + $0x198] sm:$0xff] }
 0x396   :  { %502 = vst.msk [vmem:[%s1999_s5 + $0x110] sm:$0xff] %vm61_vm2, %v2014_v29  ;;  %v1386_v34 = vadd.f32 %v271_v37, %v255_v55 }
 0x398   :  { %2065 = vst [vmem:[#allocation9_spill] sm:$0xff] %v1386_v34  ;;  %v2017_v27 = vclamps-f32 %v1386_v34, 1.0 }
 0x39d   :  { %v263_v0 = vld [vmem:[%s1998_s3 + $0x1d8] sm:$0xff] }
 0x39e   :  { %510 = vst.msk [vmem:[%s1999_s5 + $0x150] sm:$0xff] %vm61_vm2, %v2013_v35  ;;  %v1395_v52 = vadd.f32 %v271_v37, %v263_v0  ;;  %v2016_v37 = vclamps-f32 %v1373_v6, 1.0  ;;  %v192_v0 = vpop.f32.mrf.mxu1 }
 0x39f   :  { %518 = vst.msk [vmem:[%s1999_s5 + $0x190] sm:$0xff] %vm61_vm2, %v2006_v54 }
 0x3a0   :  { %2066 = vst [vmem:[#allocation10_spill] sm:$0xff] %v1395_v52  ;;  %v2018_v24 = vclamps-f32 %v1395_v52, 1.0 }
 0x3a1   :  { %526 = vst.msk [vmem:[%s1999_s5 + $0x1d0] sm:$0xff] %vm61_vm2, %v2005_v56  ;;  %v272_v56 = vmul.f32 0.000125, %v192_v0 }
 0x3a8   :  { %v208_v55 = vld [vmem:[%s1998_s3 + $0x20] sm:$0xff] }
 0x3a9   :  { %471 = vst.msk [vmem:[%s1999_s5 + $0x18] sm:$0xff] %vm61_vm2, %v2037_v30  ;;  %v1452_v59 = vadd.f32 %v272_v56, %v208_v55 }
 0x3b0   :  { %v216_v38 = vld [vmem:[%s1998_s3 + $0x60] sm:$0xff] }
 0x3b1   :  { %v224_v36 = vld [vmem:[%s1998_s3 + $0xa0] sm:$0xff]  ;;  %v1454_v53 = vadd.f32 %v272_v56, %v216_v38 }
 0x3b2   :  { %479 = vst.msk [vmem:[%s1999_s5 + $0x58] sm:$0xff] %vm61_vm2, %v2033_v31  ;;  %v1456_v50 = vadd.f32 %v272_v56, %v224_v36  ;;  %v2040_v36 = vclamps-f32 %v1452_v59, 1.0 }
 0x3b3   :  { %v2039_v38 = vclamps-f32 %v1454_v53, 1.0 }
 0x3b9   :  { %v232_v1 = vld [vmem:[%s1998_s3 + $0xe0] sm:$0xff] }
 0x3ba   :  { %487 = vst.msk [vmem:[%s1999_s5 + $0x98] sm:$0xff] %vm61_vm2, %v2031_v33  ;;  %v1458_v35 = vadd.f32 %v272_v56, %v232_v1  ;;  %v2038_v1 = vclamps-f32 %v1456_v50, 1.0 }
 0x3c1   :  { %v240_v54 = vld [vmem:[%s1998_s3 + $0x120] sm:$0xff] }
 0x3c2   :  { %v248_v32 = vld [vmem:[%s1998_s3 + $0x160] sm:$0xff]  ;;  %v1469_v17 = vadd.f32 %v272_v56, %v240_v54 }
 0x3c3   :  { %495 = vst.msk [vmem:[%s1999_s5 + $0xd8] sm:$0xff] %vm61_vm2, %v2020_v43  ;;  %v1471_v55 = vadd.f32 %v272_v56, %v248_v32  ;;  %v2030_v32 = vclamps-f32 %v1458_v35, 1.0 }
 0x3c5   :  { %v2036_v43 = vclamps-f32 %v1471_v55, 1.0 }
 0x3ca   :  { %v256_v0 = vld [vmem:[%s1998_s3 + $0x1a0] sm:$0xff] }
 0x3cb   :  { %503 = vst.msk [vmem:[%s1999_s5 + $0x118] sm:$0xff] %vm61_vm2, %v2016_v37  ;;  %v1482_v37 = vadd.f32 %v272_v56, %v256_v0 }
 0x3cd   :  { %2067 = vst [vmem:[#allocation11_spill] sm:$0xff] %v1482_v37  ;;  %v2034_v48 = vclamps-f32 %v1482_v37, 1.0 }
 0x3d2   :  { %v264_v29 = vld [vmem:[%s1998_s3 + $0x1e0] sm:$0xff] }
 0x3d3   :  { %511 = vst.msk [vmem:[%s1999_s5 + $0x158] sm:$0xff] %vm61_vm2, %v2019_v63  ;;  %v1491_v54 = vadd.f32 %v272_v56, %v264_v29  ;;  %v2032_v29 = vclamps-f32 %v1469_v17, 1.0  ;;  %v195_v56 = vpop.f32.mrf.mxu1 }
 0x3d4   :  { %519 = vst.msk [vmem:[%s1999_s5 + $0x198] sm:$0xff] %vm61_vm2, %v2017_v27  ;;  %v273_v22 = vmul.f32 0.000125, %v195_v56 }
 0x3d5   :  { %2068 = vst [vmem:[#allocation12_spill] sm:$0xff] %v1491_v54  ;;  %v2035_v47 = vclamps-f32 %v1491_v54, 1.0 }
 0x3d6   :  { %527 = vst.msk [vmem:[%s1999_s5 + $0x1d8] sm:$0xff] %vm61_vm2, %v2018_v24 }
 0x3dd   :  { %v209_v0 = vld [vmem:[%s1998_s3 + $0x28] sm:$0xff] }
 0x3de   :  { %472 = vst.msk [vmem:[%s1999_s5 + $0x20] sm:$0xff] %vm61_vm2, %v2040_v36  ;;  %v1548_v46 = vadd.f32 %v273_v22, %v209_v0 }
 0x3e5   :  { %v217_v27 = vld [vmem:[%s1998_s3 + $0x68] sm:$0xff] }
 0x3e6   :  { %v225_v24 = vld [vmem:[%s1998_s3 + $0xa8] sm:$0xff]  ;;  %v1550_v11 = vadd.f32 %v273_v22, %v217_v27  ;;  %v2043_v27 = vclamps-f32 %v1548_v46, 1.0 }
 0x3e7   :  { %480 = vst.msk [vmem:[%s1999_s5 + $0x60] sm:$0xff] %vm61_vm2, %v2039_v38  ;;  %v1552_v10 = vadd.f32 %v273_v22, %v225_v24  ;;  %v1575_v24 = vpop.permute.xlu0 %562 }
 0x3ee   :  { %v233_v63 = vld [vmem:[%s1998_s3 + $0xe8] sm:$0xff] }
 0x3ef   :  { %488 = vst.msk [vmem:[%s1999_s5 + $0xa0] sm:$0xff] %vm61_vm2, %v2038_v1  ;;  %v1554_v9 = vadd.f32 %v273_v22, %v233_v63  ;;  %v2041_v63 = vclamps-f32 %v1550_v11, 1.0 }
 0x3f6   :  { %v241_v21 = vld [vmem:[%s1998_s3 + $0x128] sm:$0xff] }
 0x3f7   :  { %v249_v20 = vld [vmem:[%s1998_s3 + $0x168] sm:$0xff]  ;;  %v1565_v33 = vadd.f32 %v273_v22, %v241_v21 }
 0x3f8   :  { %496 = vst.msk [vmem:[%s1999_s5 + $0xe0] sm:$0xff] %vm61_vm2, %v2030_v32  ;;  %v1567_v0 = vadd.f32 %v273_v22, %v249_v20  ;;  %v2045_v20 = vclamps-f32 %v1554_v9, 1.0 }
 0x3ff   :  { %v257_v56 = vld [vmem:[%s1998_s3 + $0x1a8] sm:$0xff] }
 0x400   :  { %504 = vst.msk [vmem:[%s1999_s5 + $0x120] sm:$0xff] %vm61_vm2, %v2032_v29  ;;  %v2042_v29 = vclamps-f32 %v1552_v10, 1.0  ;;  %v1580_v31 = vadd.f32 %v273_v22, %v257_v56 }
 0x402   :  { %2069 = vst [vmem:[#allocation13_spill] sm:$0xff] %v1580_v31 }
 0x407   :  { %v265_v32 = vld [vmem:[%s1998_s3 + $0x1e8] sm:$0xff] }
 0x408   :  { %512 = vst.msk [vmem:[%s1999_s5 + $0x160] sm:$0xff] %vm61_vm2, %v2036_v43  ;;  %v1589_v21 = vadd.f32 %v273_v22, %v265_v32  ;;  %v198_v32 = vpop.f32.mrf.mxu1 }
 0x409   :  { %520 = vst.msk [vmem:[%s1999_s5 + $0x1a0] sm:$0xff] %vm61_vm2, %v2034_v48  ;;  %v274_v1 = vmul.f32 0.000125, %v198_v32 }
 0x40a   :  { %2070 = vst [vmem:[#allocation14_spill] sm:$0xff] %v1589_v21  ;;  %v2074_v49 = vclamps-f32 %v1589_v21, 1.0 }
 0x40b   :  { %528 = vst.msk [vmem:[%s1999_s5 + $0x1e0] sm:$0xff] %vm61_vm2, %v2035_v47 }
 0x412   :  { %v210_v56 = vld [vmem:[%s1998_s3 + $0x30] sm:$0xff] }
 0x413   :  { %473 = vst.msk [vmem:[%s1999_s5 + $0x28] sm:$0xff] %vm61_vm2, %v2043_v27  ;;  %v282_v27 = vadd.f32 %v274_v1, %v210_v56 }
 0x41a   :  { %v218_v48 = vld [vmem:[%s1998_s3 + $0x70] sm:$0xff] }
 0x41b   :  { %v226_v47 = vld [vmem:[%s1998_s3 + $0xb0] sm:$0xff]  ;;  %v290_v30 = vadd.f32 %v274_v1, %v218_v48  ;;  %v2072_v48 = vclamps-f32 %v1567_v0, 1.0 }
 0x41c   :  { %481 = vst.msk [vmem:[%s1999_s5 + $0x68] sm:$0xff] %vm61_vm2, %v2041_v63  ;;  %v298_v22 = vadd.f32 %v274_v1, %v226_v47  ;;  %v2071_v63 = vclamps-f32 %v1565_v33, 1.0  ;;  %v906_v47 = vclamps-f32 %v282_v27, 1.0 }
 0x41e   :  { %v922_v56 = vclamps-f32 %v298_v22, 1.0 }
 0x423   :  { %v234_v43 = vld [vmem:[%s1998_s3 + $0xf0] sm:$0xff] }
 0x424   :  { %489 = vst.msk [vmem:[%s1999_s5 + $0xa8] sm:$0xff] %vm61_vm2, %v2042_v29  ;;  %v1646_v25 = vadd.f32 %v274_v1, %v234_v43  ;;  %v914_v43 = vclamps-f32 %v290_v30, 1.0  ;;  %v1684_v30 = vpop.permute.xlu0 %568 }
 0x426   :  { %v2075_v12 = vclamps-f32 %v1646_v25, 1.0 }
 0x42b   :  { %v242_v38 = vld [vmem:[%s1998_s3 + $0x130] sm:$0xff] }
 0x42c   :  { %v250_v36 = vld [vmem:[%s1998_s3 + $0x170] sm:$0xff]  ;;  %v1657_v23 = vadd.f32 %v274_v1, %v242_v38 }
 0x42d   :  { %497 = vst.msk [vmem:[%s1999_s5 + $0xe8] sm:$0xff] %vm61_vm2, %v2045_v20  ;;  %v1659_v51 = vadd.f32 %v274_v1, %v250_v36 }
 0x42e   :  { %v2076_v21 = vclamps-f32 %v1657_v23, 1.0 }
 0x42f   :  { %v2077_v19 = vclamps-f32 %v1659_v51, 1.0 }
 0x434   :  { %v258_v32 = vld [vmem:[%s1998_s3 + $0x1b0] sm:$0xff] }
 0x435   :  { %505 = vst.msk [vmem:[%s1999_s5 + $0x128] sm:$0xff] %vm61_vm2, %v2071_v63  ;;  %v1667_v29 = vadd.f32 %v274_v1, %v258_v32  ;;  %v2073_v63 = vclamps-f32 %v1580_v31, 1.0 }
 0x43c   :  { %v266_v20 = vld [vmem:[%s1998_s3 + $0x1f0] sm:$0xff] }
 0x43d   :  { %513 = vst.msk [vmem:[%s1999_s5 + $0x168] sm:$0xff] %vm61_vm2, %v2072_v48  ;;  %v1676_v38 = vadd.f32 %v274_v1, %v266_v20  ;;  %v201_v20 = vpop.f32.mrf.mxu1 }
 0x43e   :  { %521 = vst.msk [vmem:[%s1999_s5 + $0x1a8] sm:$0xff] %vm61_vm2, %v2073_v63  ;;  %v275_v63 = vmul.f32 0.000125, %v201_v20 }
 0x43f   :  { %529 = vst.msk [vmem:[%s1999_s5 + $0x1e8] sm:$0xff] %vm61_vm2, %v2074_v49  ;;  %v962_v48 = vclamps-f32 %v1676_v38, 1.0  ;;  %v2132_v38 = vld [vmem:[#allocation7_spill] sm:$0xff] }
 0x446   :  { %v211_v27 = vld [vmem:[%s1998_s3 + $0x38] sm:$0xff] }
 0x447   :  { %474 = vst.msk [vmem:[%s1999_s5 + $0x30] sm:$0xff] %vm61_vm2, %v906_v47  ;;  %v283_v52 = vadd.f32 %v275_v63, %v211_v27 }
 0x449   :  { %v907_v27 = vclamps-f32 %v283_v52, 1.0  ;;  %v1768_v52 = vpop.permute.xlu0 %570 }
 0x44b   :  { %606 = vmatpush.msra.mxu2 %v907_v27 }
 0x44d   :  { %607 = vmatpush.msra.mxu2 %v906_v47  ;;  %v2081_v47 = vclamps-f32 %v1552_v10, 1.0  ;;  %v2084_v10 = vclamps-f32 %v1456_v50, 1.0  ;;  %v2088_v50 = vclamps-f32 %v1260_v2, 1.0  ;;  %v533_v2 = vrot.slane %v1059_v58, 1 }
 0x44e   :  { %v219_v22 = vld [vmem:[%s1998_s3 + $0x78] sm:$0xff] }
 0x44f   :  { %v227_v49 = vld [vmem:[%s1998_s3 + $0xb8] sm:$0xff]  ;;  %v291_v34 = vadd.f32 %v275_v63, %v219_v22 }
 0x450   :  { %482 = vst.msk [vmem:[%s1999_s5 + $0x70] sm:$0xff] %vm61_vm2, %v914_v43  ;;  %v299_v54 = vadd.f32 %v275_v63, %v227_v49 }
 0x451   :  { %v915_v22 = vclamps-f32 %v291_v34, 1.0 }
 0x452   :  { %v923_v49 = vclamps-f32 %v299_v54, 1.0  ;;  %v2080_v54 = vclamps-f32 %v1550_v11, 1.0  ;;  %v565_v11 = vpop.permute.xlu1 %564 }
 0x453   :  { %629 = vmatpush.msra.mxu3 %v915_v22 }
 0x454   :  { %652 = vmatpush.msrb.mxu0 %v923_v49 }
 0x455   :  { %630 = vmatpush.msra.mxu3 %v914_v43  ;;  %v2082_v43 = vclamps-f32 %v1452_v59, 1.0  ;;  %v2086_v59 = vclamps-f32 %v1358_v60, 1.0  ;;  %v2092_v60 = vclamps-f32 %v1166_v40, 1.0 }
 0x456   :  { %653 = vmatpush.msrb.mxu0 %v922_v56 }
 0x457   :  { %v235_v32 = vld [vmem:[%s1998_s3 + $0xf8] sm:$0xff]  ;;  %631 = vmatpush.msra.mxu3 %v2080_v54 }
 0x458   :  { %490 = vst.msk [vmem:[%s1999_s5 + $0xb0] sm:$0xff] %vm61_vm2, %v922_v56  ;;  %v307_v37 = vadd.f32 %v275_v63, %v235_v32  ;;  %654 = vmatpush.msrb.mxu0 %v2081_v47  ;;  %v2087_v56 = vclamps-f32 %v1360_v61, 1.0  ;;  %v534_v61 = vrot.slane %v1059_v58, 2  ;;  %v2117_v47 = vld [vmem:[#allocation2_spill] sm:$0xff] }
 0x45a   :  { %655 = vmatpush.msrb.mxu0 %v2084_v10 }
 0x45c   :  { %656 = vmatpush.msrb.mxu0 %v2087_v56 }
 0x45f   :  { %v243_v1 = vld [vmem:[%s1998_s3 + $0x138] sm:$0xff] }
 0x460   :  { %v251_v36 = vld [vmem:[%s1998_s3 + $0x178] sm:$0xff]  ;;  %v315_v26 = vadd.f32 %v275_v63, %v243_v1 }
 0x461   :  { %498 = vst.msk [vmem:[%s1999_s5 + $0xf0] sm:$0xff] %vm61_vm2, %v2075_v12  ;;  %v323_v31 = vadd.f32 %v275_v63, %v251_v36  ;;  %v931_v36 = vclamps-f32 %v307_v37, 1.0 }
 0x463   :  { %v947_v34 = vclamps-f32 %v323_v31, 1.0  ;;  %v2079_v31 = vclamps-f32 %v1548_v46, 1.0  ;;  %v2083_v46 = vclamps-f32 %v1454_v53, 1.0  ;;  %v2085_v53 = vclamps-f32 %v1356_v57, 1.0 }
 0x464   :  { %v2091_v57 = vclamps-f32 %v1164_v39, 1.0  ;;  %v1839_v39 = vsel %vm586_vm8, %v1059_v58, %v1575_v24  ;;  %v2099_v24 = vclamps-f32 %v1659_v51, 1.0  ;;  %v2106_v51 = vclamps-f32 %v1362_v62, 1.0 }
 0x465   :  { %608 = vmatpush.msra.mxu2 %v2079_v31  ;;  %632 = vmatpush.msra.mxu3 %v2083_v46  ;;  %v2112_v62 = vclamps-f32 %v1170_v42, 1.0  ;;  %v2114_v31 = vclamps-f32 %v1183_v45, 1.0  ;;  %v2116_v42 = vclamps-f32 %v1103_v18, 1.0  ;;  %v2118_v45 = vclamps-f32 %v2117_v47, 1.0  ;;  %v2120_v18 = vld [vmem:[#allocation13_spill] sm:$0xff]  ;;  %v2124_v46 = vld [vmem:[#allocation11_spill] sm:$0xff] }
 0x466   :  { %v2125_v10 = vclamps-f32 %v2124_v46, 1.0 }
 0x467   :  { %609 = vmatpush.msra.mxu2 %v2082_v43  ;;  %633 = vmatpush.msra.mxu3 %v2086_v59  ;;  %v2134_v59 = vld [vmem:[#allocation8_spill] sm:$0xff] }
 0x468   :  { %v259_v20 = vld [vmem:[%s1998_s3 + $0x1b8] sm:$0xff] }
 0x469   :  { %506 = vst.msk [vmem:[%s1999_s5 + $0x130] sm:$0xff] %vm61_vm2, %v2076_v21  ;;  %v1744_v32 = vadd.f32 %v275_v63, %v259_v20  ;;  %v2078_v21 = vclamps-f32 %v1667_v29, 1.0  ;;  %610 = vmatpush.msra.mxu2 %v2085_v53  ;;  %v2090_v20 = vclamps-f32 %v1264_v4, 1.0  ;;  %v2095_v4 = vclamps-f32 %v1094_v14, 1.0  ;;  %v575_v14 = vpop.permute.xlu1 %574 }
 0x46b   :  { %v955_v37 = vclamps-f32 %v1744_v32, 1.0  ;;  %611 = vmatpush.msra.mxu2 %v2088_v50  ;;  %657 = vmatpush.msrb.mxu0 %v2090_v20  ;;  %v2126_v32 = vld [vmem:[#allocation12_spill] sm:$0xff]  ;;  %v538_v50 = vrot.slane %v1059_v58, 6  ;;  %v2136_v20 = vld [vmem:[#allocation5_spill] sm:$0xff] }
 0x46d   :  { %612 = vmatpush.msra.mxu2 %v2091_v57  ;;  %v2138_v57 = vld [vmem:[#allocation6_spill] sm:$0xff] }
 0x470   :  { %v267_v12 = vld [vmem:[%s1998_s3 + $0x1f8] sm:$0xff] }
 0x471   :  { %514 = vst.msk [vmem:[%s1999_s5 + $0x170] sm:$0xff] %vm61_vm2, %v2077_v19  ;;  %v1752_v1 = vadd.f32 %v275_v63, %v267_v12  ;;  %v939_v19 = vclamps-f32 %v315_v26, 1.0  ;;  %v2089_v63 = vclamps-f32 %v1262_v3, 1.0  ;;  %v567_v12 = vpop.permute.xlu0 %566  ;;  %v2094_v3 = vclamps-f32 %v1092_v13, 1.0 }
 0x472   :  { %522 = vst.msk [vmem:[%s1999_s5 + $0x1b0] sm:$0xff] %vm61_vm2, %v2078_v21  ;;  %v1842_v40 = vsel %vm586_vm8, %v534_v61, %v567_v12  ;;  %v1849_v13 = vsel %vm586_vm8, %v533_v2, %v565_v11  ;;  %v2101_v21 = vclamps-f32 %v1565_v33, 1.0  ;;  %v2108_v33 = vclamps-f32 %v1375_v28, 1.0  ;;  %v2140_v2 = vld [vmem:[#allocation3_spill] sm:$0xff] }
 0x473   :  { %530 = vst.msk [vmem:[%s1999_s5 + $0x1f0] sm:$0xff] %vm61_vm2, %v962_v48  ;;  %v963_v26 = vclamps-f32 %v1752_v1, 1.0  ;;  %634 = vmatpush.msra.mxu3 %v2089_v63  ;;  %613 = vmatpush.msra.mxu2 %v2094_v3  ;;  %v536_v28 = vrot.slane %v1059_v58, 4  ;;  %v2128_v1 = vld [vmem:[#allocation9_spill] sm:$0xff]  ;;  %v2135_v11 = vclamps-f32 %v2134_v59, 1.0  ;;  %v539_v63 = vrot.slane %v1059_v58, 7 }
 0x474   :  { %475 = vst.msk [vmem:[%s1999_s5 + $0x38] sm:$0xff] %vm61_vm2, %v907_v27  ;;  %v2093_v27 = vclamps-f32 %v1168_v41, 1.0  ;;  %964 = vmatmul.msk.f32.vlgmr.msra.gmra.mxu2 %vm61_vm2, %v1839_v39  ;;  %v2097_v41 = vclamps-f32 %v1646_v25, 1.0  ;;  %v2104_v25 = vclamps-f32 %v1469_v17, 1.0  ;;  %v2111_v17 = vclamps-f32 %v1279_v8, 1.0 }
 0x475   :  { %483 = vst.msk [vmem:[%s1999_s5 + $0x78] sm:$0xff] %vm61_vm2, %v915_v22  ;;  %635 = vmatpush.msra.mxu3 %v2092_v60  ;;  %v2096_v22 = vclamps-f32 %v1096_v15, 1.0  ;;  %675 = vmatpush.msrb.mxu2 %v931_v36  ;;  %v2098_v15 = vclamps-f32 %v1657_v23, 1.0  ;;  %v2105_v23 = vclamps-f32 %v1471_v55, 1.0  ;;  %v535_v55 = vrot.slane %v1059_v58, 3 }
 0x476   :  { %491 = vst.msk [vmem:[%s1999_s5 + $0xb8] sm:$0xff] %vm61_vm2, %v923_v49  ;;  %658 = vmatpush.msrb.mxu0 %v2093_v27  ;;  %v2100_v49 = vclamps-f32 %v1554_v9, 1.0  ;;  %v2107_v9 = vclamps-f32 %v1373_v6, 1.0  ;;  %v2113_v6 = vclamps-f32 %v1181_v44, 1.0  ;;  %v2115_v8 = vclamps-f32 %v1098_v16, 1.0 }
 0x477   :  { %499 = vst.msk [vmem:[%s1999_s5 + $0xf8] sm:$0xff] %vm61_vm2, %v931_v36  ;;  %636 = vmatpush.msra.mxu3 %v2095_v4  ;;  %676 = vmatpush.msrb.mxu2 %v2097_v41  ;;  %v2102_v36 = vclamps-f32 %v1567_v0, 1.0  ;;  %v2109_v0 = vclamps-f32 %v1266_v5, 1.0  ;;  %v537_v5 = vrot.slane %v1059_v58, 5  ;;  %v1904_v44 = vsel %vm586_vm8, %v536_v28, %v1768_v52  ;;  %v2122_v52 = vld [vmem:[#allocation14_spill] sm:$0xff]  ;;  %v2142_v4 = vld [vmem:[#allocation4_spill] sm:$0xff] }
 0x478   :  { %507 = vst.msk [vmem:[%s1999_s5 + $0x138] sm:$0xff] %vm61_vm2, %v939_v19  ;;  %659 = vmatpush.msrb.mxu0 %v2096_v22  ;;  %965 = vmatmul.msk.f32.vlgmr.msra.gmra.mxu3 %vm61_vm2, %v1849_v13  ;;  %v2119_v16 = vclamps-f32 %v1667_v29, 1.0  ;;  %v2123_v43 = vclamps-f32 %v2122_v52, 1.0  ;;  %v2130_v29 = vld [vmem:[#allocation10_spill] sm:$0xff]  ;;  %v2137_v12 = vclamps-f32 %v2136_v20, 1.0  ;;  %v2139_v60 = vclamps-f32 %v2138_v57, 1.0 }
 0x479   :  { %515 = vst.msk [vmem:[%s1999_s5 + $0x178] sm:$0xff] %vm61_vm2, %v947_v34  ;;  %966 = vmatmul.msk.f32.vlgmr.msrb.gmra.mxu0 %vm61_vm2, %v1842_v40  ;;  %698 = vmatpush.msrb.mxu3 %v939_v19  ;;  %v2103_v19 = vclamps-f32 %v1458_v35, 1.0  ;;  %v2110_v35 = vclamps-f32 %v1277_v7, 1.0  ;;  %v1896_v7 = vsel %vm586_vm8, %v535_v55, %v1684_v30  ;;  %v2121_v30 = vclamps-f32 %v2120_v18, 1.0  ;;  %v577_v56 = vpop.permute.xlu0 %576 }
 0x47a   :  { %523 = vst.msk [vmem:[%s1999_s5 + $0x1b8] sm:$0xff] %vm61_vm2, %v955_v37  ;;  %721 = vmatpush.msra.mxu0 %v947_v34  ;;  %677 = vmatpush.msrb.mxu2 %v2100_v49  ;;  %v573_v34 = vpop.permute.xlu1 %572  ;;  %v2131_v53 = vclamps-f32 %v2130_v29, 1.0  ;;  %v1948_v61 = vsel %vm586_vm8, %v538_v50, %v575_v14  ;;  %v1951_v27 = vsel %vm586_vm8, %v539_v63, %v577_v56  ;;  %v2141_v3 = vclamps-f32 %v2140_v2, 1.0 }
 0x47b   :  { %531 = vst.msk [vmem:[%s1999_s5 + $0x1f8] sm:$0xff] %vm61_vm2, %v963_v26  ;;  %699 = vmatpush.msrb.mxu3 %v2098_v15  ;;  %v1907_v54 = vsel %vm586_vm8, %v537_v5, %v573_v34  ;;  %v2143_v22 = vclamps-f32 %v2142_v4, 1.0 }
 0x47c   :  { %722 = vmatpush.msra.mxu0 %v2099_v24  ;;  %678 = vmatpush.msrb.mxu2 %v2103_v19 }
 0x47d   :  { %700 = vmatpush.msrb.mxu3 %v2101_v21 }
 0x47e   :  { %723 = vmatpush.msra.mxu0 %v2102_v36  ;;  %679 = vmatpush.msrb.mxu2 %v2106_v51 }
 0x47f   :  { %701 = vmatpush.msrb.mxu3 %v2104_v25 }
 0x480   :  { %724 = vmatpush.msra.mxu0 %v2105_v23  ;;  %680 = vmatpush.msrb.mxu2 %v2109_v0 }
 0x481   :  { %702 = vmatpush.msrb.mxu3 %v2107_v9 }
 0x482   :  { %725 = vmatpush.msra.mxu0 %v2108_v33  ;;  %681 = vmatpush.msrb.mxu2 %v2112_v62 }
 0x483   :  { %703 = vmatpush.msrb.mxu3 %v2110_v35 }
 0x484   :  { %726 = vmatpush.msra.mxu0 %v2111_v17  ;;  %682 = vmatpush.msrb.mxu2 %v2115_v8  ;;  %v989_v17 = vmov 64.0  }
 0x485   :  { %704 = vmatpush.msrb.mxu3 %v2113_v6  ;;  %967 = vmatmul.msk.f32.vlgmr.msrb.gmra.mxu2 %vm61_vm2, %v1896_v7  ;;  %985 = vrcp.f32 %v989_v17 }
 0x486   :  { %727 = vmatpush.msra.mxu0 %v2114_v31  ;;  %744 = vmatpush.msra.mxu2 %v955_v37  ;;  %v2127_v37 = vclamps-f32 %v2126_v32, 1.0 }
 0x487   :  { %705 = vmatpush.msrb.mxu3 %v2116_v42 }
 0x488   :  { %728 = vmatpush.msra.mxu0 %v2118_v45  ;;  %968 = vmatmul.msk.f32.vlgmr.msrb.gmra.mxu3 %vm61_vm2, %v1904_v44 }
 0x489   :  { %969 = vmatmul.msk.f32.vlgmr.msra.gmra.mxu0 %vm61_vm2, %v1907_v54  ;;  %767 = vmatpush.msra.mxu3 %v963_v26  ;;  %v2129_v26 = vclamps-f32 %v2128_v1, 1.0 }
 0x48a   :  { %745 = vmatpush.msra.mxu2 %v2119_v16 }
 0x48b   :  { %768 = vmatpush.msra.mxu3 %v962_v48  ;;  %v2133_v48 = vclamps-f32 %v2132_v38, 1.0  ;;  %v986_v55 = vpop.eup %985 }
 0x48c   :  { %746 = vmatpush.msra.mxu2 %v2121_v30  ;;  %v805_v34 = vmul.f32 64.0, %v986_v55  ;;  %vm809_vm10 = vweird.f32 %v986_v55 }
 0x48d   :  { %769 = vmatpush.msra.mxu3 %v2123_v43 }
 0x48e   :  { %747 = vmatpush.msra.mxu2 %v2125_v10  ;;  %v806_v62 = vsub.f32 1.0, %v805_v34 }
 0x48f   :  { %770 = vmatpush.msra.mxu3 %v2127_v37 }
 0x490   :  { %748 = vmatpush.msra.mxu2 %v2129_v26  ;;  %v807_v28 = vmul.f32 %v986_v55, %v806_v62 }
 0x491   :  { %771 = vmatpush.msra.mxu3 %v2131_v53 }
 0x492   :  { %749 = vmatpush.msra.mxu2 %v2133_v48  ;;  %v808_v5 = vadd.f32 %v986_v55, %v807_v28 }
 0x493   :  { %772 = vmatpush.msra.mxu3 %v2135_v11 }
 0x494   :  { %750 = vmatpush.msra.mxu2 %v2137_v12  ;;  %v810_v47 = vsel %vm809_vm10, %v986_v55, %v808_v5 }
 0x495   :  { %773 = vmatpush.msra.mxu3 %v2139_v60 }
 0x496   :  { %751 = vmatpush.msra.mxu2 %v2141_v3 }
 0x497   :  { %774 = vmatpush.msra.mxu3 %v2143_v22  ;;  %970 = vmatmul.msk.f32.vlgmr.msra.gmra.mxu2 %vm61_vm2, %v1948_v61 }
 0x498   :  { %971 = vmatmul.msk.f32.vlgmr.msra.gmra.mxu3 %vm61_vm2, %v1951_v27 }
 0x4f6   :  { %v661_v58 = vpop.f32.mrf.mxu0 }
 0x4f7   :  { %v786_v14 = vsel %vm779_vm9, %v661_v58, 0.0  ;;  %v615_v41 = vpop.f32.mrf.mxu2 }
 0x4f8   :  { %787 = vadd.xlane.f32.xlu0 %v786_v14  ;;  %v780_v24 = vsel %vm779_vm9, %v615_v41, 0.0 }
 0x4f9   :  { %781 = vadd.xlane.f32.xlu1 %v780_v24 }
 0x4fb   :  { %v638_v15 = vpop.f32.mrf.mxu3 }
 0x4fc   :  { %v783_v49 = vsel %vm779_vm9, %v638_v15, 0.0 }
 0x4fd   :  { %784 = vadd.xlane.f32.xlu2 %v783_v49 }
 0x506   :  { %v1964_v21 = vpop.f32.mrf.mxu0 }
 0x507   :  { %v795_v36 = vsel %vm779_vm9, %v1964_v21, 0.0 }
 0x508   :  { %796 = vadd.xlane.f32.xlu0 %v795_v36  ;;  %v684_v19 = vpop.f32.mrf.mxu2 }
 0x509   :  { %v789_v51 = vsel %vm779_vm9, %v684_v19, 0.0 }
 0x50b   :  { %v707_v25 = vpop.f32.mrf.mxu3 }
 0x50c   :  { %v792_v23 = vsel %vm779_vm9, %v707_v25, 0.0 }
 0x50d   :  { %793 = vadd.xlane.f32.xlu1 %v792_v23 }
 0x510   :  { %790 = vadd.xlane.f32.xlu0 %v789_v51 }
 0x51a   :  { %v753_v9 = vpop.f32.mrf.mxu2 }
 0x51b   :  { %v776_v33 = vpop.f32.mrf.mxu3  ;;  %v798_v0 = vsel %vm779_vm9, %v753_v9, 0.0 }
 0x51c   :  { %v801_v35 = vsel %vm779_vm9, %v776_v33, 0.0  ;;  %799 = vadd.xlane.f32.xlu1 %v798_v0 }
 0x51d   :  { %802 = vadd.xlane.f32.xlu0 %v801_v35 }
 0x56b   :  { %v788_v6 = vpop.xlane.xlu0 %787 }
 0x56c   :  { %v782_v42 = vpop.xlane.xlu1 %781  ;;  %v813_v30 = vmul.f32 %v810_v47, %v788_v6 }
 0x56d   :  { %v811_v43 = vmul.f32 %v810_v47, %v782_v42 }
 0x56e   :  { %v821_v37 = vsub.f32 %v661_v58, %v813_v30 }
 0x56f   :  { %v819_v26 = vsub.f32 %v615_v41, %v811_v43 }
 0x570   :  { %v785_v8 = vpop.xlane.xlu2 %784  ;;  %v829_v48 = vadd.f32 %v821_v37, %v1842_v40 }
 0x571   :  { %v812_v45 = vmul.f32 %v810_v47, %v785_v8  ;;  %v827_v11 = vadd.f32 %v819_v26, %v1839_v39 }
 0x572   :  { %v846_v20 = vrot.slane %v829_v48, 6 }
 0x573   :  { %v820_v16 = vsub.f32 %v638_v15, %v812_v45 }
 0x575   :  { %v828_v10 = vadd.f32 %v820_v16, %v1849_v13 }
 0x577   :  { %v843_v29 = vrot.slane %v828_v10, 7 }
 0x579   :  { %v845_v56 = vsel %vm844_vm11, %v843_v29, %v827_v11  ;;  %v866_v50 = vsel %vm847_vm12, %v843_v29, %v827_v11 }
 0x57a   :  { %v867_v3 = vsel %vm850_vm13, %v846_v20, %v866_v50 }
 0x57b   :  { %v797_v31 = vpop.xlane.xlu0 %796 }
 0x57c   :  { %v816_v53 = vmul.f32 %v810_v47, %v797_v31 }
 0x57e   :  { %v824_v13 = vsub.f32 %v1964_v21, %v816_v53 }
 0x580   :  { %v794_v46 = vpop.xlane.xlu1 %793  ;;  %v832_v4 = vadd.f32 %v824_v13, %v1907_v54 }
 0x581   :  { %v815_v1 = vmul.f32 %v810_v47, %v794_v46 }
 0x582   :  { %v855_v21 = vrot.slane %v832_v4, 3 }
 0x583   :  { %v791_v18 = vpop.xlane.xlu0 %790  ;;  %v823_v59 = vsub.f32 %v707_v25, %v815_v1 }
 0x584   :  { %v814_v52 = vmul.f32 %v810_v47, %v791_v18 }
 0x585   :  { %v831_v12 = vadd.f32 %v823_v59, %v1904_v44 }
 0x586   :  { %v822_v32 = vsub.f32 %v684_v19, %v814_v52 }
 0x587   :  { %v852_v58 = vrot.slane %v831_v12, 4 }
 0x588   :  { %v830_v38 = vadd.f32 %v822_v32, %v1896_v7  ;;  %v848_v7 = vsel %vm847_vm12, %v846_v20, %v845_v56 }
 0x58a   :  { %v849_v63 = vrot.slane %v830_v38, 5 }
 0x58c   :  { %v851_v22 = vsel %vm850_vm13, %v849_v63, %v848_v7  ;;  %v868_v39 = vsel %vm853_vm14, %v849_v63, %v867_v3 }
 0x58d   :  { %v854_v24 = vsel %vm853_vm14, %v852_v58, %v851_v22  ;;  %v869_v49 = vsel %vm856_vm15, %v852_v58, %v868_v39 }
 0x58e   :  { %v857_v54 = vsel %vm856_vm15, %v855_v21, %v854_v24  ;;  %v870_v25 = vsel %vm859_vm0, %v855_v21, %v869_v49 }
 0x58f   :  { %v800_v60 = vpop.xlane.xlu1 %799 }
 0x590   :  { %v803_v57 = vpop.xlane.xlu0 %802  ;;  %v817_v40 = vmul.f32 %v810_v47, %v800_v60 }
 0x591   :  { %v818_v2 = vmul.f32 %v810_v47, %v803_v57 }
 0x592   :  { %v825_v41 = vsub.f32 %v753_v9, %v817_v40 }
 0x593   :  { %v826_v14 = vsub.f32 %v776_v33, %v818_v2 }
 0x594   :  { %v833_v15 = vadd.f32 %v825_v41, %v1948_v61 }
 0x595   :  { %v834_v44 = vadd.f32 %v826_v14, %v1951_v27 }
 0x596   :  { %v858_v36 = vrot.slane %v833_v15, 2 }
 0x597   :  { %v861_v19 = vrot.slane %v834_v44, 1 }
 0x598   :  { %v871_v23 = vsel %vm862_vm1, %v858_v36, %v870_v25  ;;  %v860_v51 = vsel %vm859_vm0, %v858_v36, %v857_v54 }
 0x599   :  { %874 = vrot.lane.b32.xlu0 %v861_v19, %s988_s1  ;;  %872 = vrot.lane.b32.xlu1 %v871_v23, %s988_s1  ;;  %v863_v9 = vsel %vm862_vm1, %v861_v19, %v860_v51 }
 0x59a   :  { %865 = vst.msk [vmem:[%s2000_s4] sm:$0xff] %vm61_vm2, %v863_v9 }
 0x60b   :  { %v875_v61 = vpop.permute.xlu0 %874  ;;  %v873_v27 = vpop.permute.xlu1 %872 }
 0x60c   :  { %881 = vst.msk [vmem:[%s2000_s4 + $0x7] sm:$0x1] %vm880_vm3, %v875_v61 }
 0x60d   :  { %879 = vst.msk [vmem:[%s2000_s4 - $0x1] sm:$0xfe] %vm878_vm4, %v873_v27 }

// kernel: multi_layer_hebbian_forward.3
= control target key start
LH: loop header
LB: loop body
LE: loop exit
PB: predicated region body
PF: predicated region fallthrough
CT: control target
= control target key end

     0   :  { %v1153_v2 = vmov 0   ;;  %vm42_vm0 = vcmask 588800   ;;  %vm76_vm1 = vcmask 130048   ;;  %vm197_vm10 = vcmask 261120   ;;  %s1913_s2 = inlined_call_operand.vmem [shape: f32[72,32], index: 2, kind: input, shape index: {}]   ;;  %s1914_s1 = inlined_call_operand.vmem [shape: f32[16,1], index: 1, kind: input, shape index: {}]   ;;  %s1915_s0 = inlined_call_operand.vmem [shape: f32[16,72], index: 0, kind: input, shape index: {}]   ;;  %s1916_s3 = inlined_call_operand.vmem [shape: f32[16,16,16], index: 3, kind: input, shape index: {}, may-alias: {3,5}]   ;;  %s1917_s5 = inlined_call_operand.vmem [shape: f32[16,16,16], index: 5, kind: output, shape index: {1}, may-alias: {3,5}]   ;;  %s1918_s4 = inlined_call_operand.vmem [shape: f32[16,32], index: 4, kind: output, shape index: {0}]  }
   0x1   :  { %v29_v0 = vld [vmem:[%s1913_s2 + $0x40] sm:$0xff]  ;;  %v28_v1 = vld [vmem:[%s1913_s2 + $0x38] sm:$0xff]  ;;  %1134 = vset.pattern.permute.xlu0 %v1153_v2  ;;  %v27_v3 = vld [vmem:[%s1913_s2 + $0x30] sm:$0xff]  ;;  %vm497_vm11 = vcmask 1040384   ;;  %vm882_vm12 = vcmask 123904   ;;  %vm1003_vm14 = vcmask 1041409  }
   0x2   :  { %56 = vmatpush.msra.mxu0 %v29_v0  ;;  %v30_v4 = vld [vmem:[%s1914_s1] sm:$0xff]  ;;  %v26_v5 = vld [vmem:[%s1913_s2 + $0x28] sm:$0xff]  ;;  %v24_v7 = vld [vmem:[%s1913_s2 + $0x18] sm:$0xff]  ;;  %vm1006_vm15 = vcmask 1042434  }
   0x3   :  { %34 = vperm.xlu0 %1134, %v30_v4   ;;  %v25_v6 = vld [vmem:[%s1913_s2 + $0x20] sm:$0xff]  ;;  %v31_v8 = vld [vmem:[%s1914_s1 + $0x8] sm:$0xff]  ;;  %v23_v9 = vld [vmem:[%s1913_s2 + $0x10] sm:$0xff] }
   0x4   :  { %57 = vmatpush.msra.mxu0 %v28_v1  ;;  %v22_v10 = vld [vmem:[%s1913_s2 + $0x8] sm:$0xff]  ;;  %v21_v11 = vld [vmem:[%s1913_s2] sm:$0xff]  ;;  %s1154_s2 = smov 112  }
   0x5   :  { %v19_v12 = vld [vmem:[%s1915_s0] sm:$0xff]  ;;  %v20_v13 = vld [vmem:[%s1915_s0 + $0x8] sm:$0xff] }
   0x6   :  { %58 = vmatpush.msra.mxu0 %v27_v3 }
   0x8   :  { %59 = vmatpush.msra.mxu0 %v26_v5 }
   0xa   :  { %60 = vmatpush.msra.mxu0 %v25_v6 }
   0xb   :  { %39 = vperm.xlu0 %1134, %v31_v8  }
   0xc   :  { %61 = vmatpush.msra.mxu0 %v24_v7 }
   0xe   :  { %62 = vmatpush.msra.mxu0 %v23_v9 }
  0x10   :  { %63 = vmatpush.msra.mxu0 %v22_v10 }
  0x12   :  { %64 = vmatpush.msra.mxu0 %v21_v11 }
  0x13   :  { %1077 = vmatmul.msk.f32.vlgmr.msra.gmra.mxu0 %vm42_vm0, %v19_v12 }
  0x1b   :  { %1078 = vmatmul.msk.f32.gmra.mxu0 %vm42_vm0, %v20_v13  ;;  %vm1009_vm0 = vcmask 1043459  }
  0x75   :  { %v35_v14 = vpop.permute.xlu0 %34 }
  0x7d   :  { %v40_v20 = vpop.permute.xlu0 %39 }
  0x90   :  { %v66_v15 = vpop.f32.mrf.mxu0 }
  0x91   :  { %v67_v16 = vadd.f32 %v66_v15, %v35_v14 }
  0x93   :  { %v1226_v17 = vmax.f32 %v67_v16, 0.0 }
  0x95   :  { %v74_v18 = vmul.f32 %v1226_v17, %v1226_v17 }
  0x97   :  { %115 = vrot.lane.b32.xlu1 %v74_v18, %s1154_s2  ;;  %v77_v19 = vsel %vm76_vm1, %v74_v18, 0.0 }
  0x98   :  { %v69_v21 = vpop.f32.mrf.mxu0  ;;  %78 = vadd.xlane.f32.xlu0 %v77_v19 }
  0x99   :  { %v70_v22 = vadd.f32 %v69_v21, %v40_v20 }
  0x9b   :  { %v1232_v23 = vmax.f32 %v70_v22, 0.0 }
  0x9d   :  { %v75_v24 = vmul.f32 %v1232_v23, %v1232_v23 }
  0x9f   :  { %117 = vrot.lane.b32.xlu1 %v75_v24, %s1154_s2  ;;  %v80_v25 = vsel %vm76_vm1, %v75_v24, 0.0 }
  0xc9   :  { %81 = vadd.xlane.f32.xlu1 %v80_v25 }
 0x109   :  { %v116_v26 = vpop.permute.xlu1 %115 }
 0x10a   :  { %v121_v27 = vsel %vm76_vm1, %v116_v26, 0.0 }
 0x10b   :  { %122 = vadd.xlane.f32.xlu2 %v121_v27  ;;  %v1240_v46 = vpop.xlane.xlu0 %78 }
 0x10c   :  { %vm90_vm6 = vcmp.eq.f32.partialorder %v1240_v46, inf  ;;  %v93_v26 = vand.u32 2147483648, %v1240_v46  ;;  %vm92_vm7 = vcmp.eq.f32.partialorder %v1240_v46, 0.0 }
 0x111   :  { %v118_v28 = vpop.permute.xlu1 %117 }
 0x112   :  { %v124_v29 = vsel %vm76_vm1, %v118_v28, 0.0 }
 0x113   :  { %125 = vadd.xlane.f32.xlu2 %v124_v29 }
 0x13c   :  { %v1243_v55 = vpop.xlane.xlu1 %81 }
 0x13d   :  { %vm102_vm8 = vcmp.eq.f32.partialorder %v1243_v55, inf  ;;  %vm104_vm9 = vcmp.eq.f32.partialorder %v1243_v55, 0.0 }
 0x17e   :  { %v123_v30 = vpop.xlane.xlu2 %122 }
 0x17f   :  { %1135 = vrsqrt.f32 %v123_v30  ;;  %vm134_vm2 = vcmp.eq.f32.partialorder %v123_v30, inf  ;;  %v137_v42 = vand.u32 2147483648, %v123_v30  ;;  %vm136_vm3 = vcmp.eq.f32.partialorder %v123_v30, 0.0 }
 0x185   :  { %v1136_v31 = vpop.eup %1135 }
 0x186   :  { %v128_v32 = vmul.f32 %v1136_v31, %v123_v30  ;;  %v126_v33 = vpop.xlane.xlu2 %125 }
 0x187   :  { %1137 = vrsqrt.f32 %v126_v33  ;;  %vm146_vm4 = vcmp.eq.f32.partialorder %v126_v33, inf  ;;  %v149_v51 = vand.u32 2147483648, %v126_v33  ;;  %vm148_vm5 = vcmp.eq.f32.partialorder %v126_v33, 0.0 }
 0x188   :  { %v129_v34 = vmul.f32 %v1136_v31, %v128_v32 }
 0x18a   :  { %v130_v35 = vmul.f32 0.5, %v129_v34  ;;  %v105_v34 = vand.u32 2147483648, %v1243_v55 }
 0x18c   :  { %v131_v36 = vsub.f32 1.5, %v130_v35 }
 0x18d   :  { %v1138_v37 = vpop.eup %1137 }
 0x18e   :  { %v132_v38 = vmul.f32 %v1136_v31, %v131_v36  ;;  %v140_v39 = vmul.f32 %v1138_v37, %v126_v33 }
 0x190   :  { %v133_v40 = vmul.f32 %v132_v38, %v123_v30  ;;  %v141_v41 = vmul.f32 %v1138_v37, %v140_v39 }
 0x192   :  { %v135_v43 = vsel %vm134_vm2, %v123_v30, %v133_v40  ;;  %v142_v44 = vmul.f32 0.5, %v141_v41  ;;  %vm1012_vm2 = vcmask 1044484  }
 0x193   :  { %v138_v45 = vsel %vm136_vm3, %v137_v42, %v135_v43  ;;  %vm1015_vm3 = vcmask 1045509  }
 0x194   :  { %v151_v47 = vadd.f32 1e-06, %v138_v45  ;;  %v143_v48 = vsub.f32 1.5, %v142_v44 }
 0x196   :  { %1139 = vrcp.f32 %v151_v47  ;;  %v144_v49 = vmul.f32 %v1138_v37, %v143_v48 }
 0x197   :  { %1141 = vrsqrt.f32 %v1240_v46 }
 0x198   :  { %v145_v50 = vmul.f32 %v144_v49, %v126_v33 }
 0x19a   :  { %v147_v52 = vsel %vm146_vm4, %v126_v33, %v145_v50  ;;  %vm1018_vm4 = vcmask 1046534  }
 0x19b   :  { %v150_v53 = vsel %vm148_vm5, %v149_v51, %v147_v52  ;;  %vm1021_vm5 = vcmask 1047559  }
 0x19c   :  { %v1140_v54 = vpop.eup %1139  ;;  %v152_v56 = vadd.f32 1e-06, %v150_v53 }
 0x19d   :  { %v1142_v57 = vpop.eup %1141  ;;  %v155_v58 = vmul.f32 %v1140_v54, %v1226_v17 }
 0x19e   :  { %1143 = vrcp.f32 %v152_v56  ;;  %v84_v61 = vmul.f32 %v1142_v57, %v1240_v46 }
 0x19f   :  { %1145 = vrsqrt.f32 %v1243_v55  ;;  %159 = vrot.lane.b32.xlu2 %v155_v58, %s1154_s2  ;;  %v433_v59 = vperm.slane %v155_v58, 0  ;;  %v419_v60 = vrot.slane %v155_v58, 1  ;;  %v420_v63 = vrot.slane %v155_v58, 2 }
 0x1a0   :  { %v85_v1 = vmul.f32 %v1142_v57, %v84_v61  ;;  %v421_v4 = vrot.slane %v155_v58, 3  ;;  %v422_v9 = vrot.slane %v155_v58, 4  ;;  %v423_v12 = vrot.slane %v155_v58, 5 }
 0x1a1   :  { %449 = vrot.lane.b32.xlu0 %v433_v59, %s1154_s2  ;;  %v434_v62 = vperm.slane %v419_v60, 0  ;;  %v435_v5 = vperm.slane %v420_v63, 0  ;;  %v425_v18 = vrot.slane %v155_v58, 7  ;;  %v424_v21 = vrot.slane %v155_v58, 6 }
 0x1a2   :  { %v86_v6 = vmul.f32 0.5, %v85_v1  ;;  %v436_v8 = vperm.slane %v421_v4, 0  ;;  %v437_v13 = vperm.slane %v422_v9, 0  ;;  %v438_v16 = vperm.slane %v423_v12, 0  ;;  %v247_v4 = vld [vmem:[%s1916_s3 + $0xa0] sm:$0xff] }
 0x1a3   :  { %451 = vrot.lane.b32.xlu1 %v434_v62, %s1154_s2  ;;  %v440_v22 = vperm.slane %v425_v18, 0  ;;  %v439_v27 = vperm.slane %v424_v21, 0 }
 0x1a4   :  { %v1144_v0 = vpop.eup %1143  ;;  %v87_v10 = vsub.f32 1.5, %v86_v6  ;;  %v231_v6 = vld [vmem:[%s1916_s3 + $0x20] sm:$0xff] }
 0x1a5   :  { %v1146_v2 = vpop.eup %1145  ;;  %v1252_v3 = vmul.f32 %v1144_v0, %v1232_v23  ;;  %v227_v0 = vld [vmem:[%s1916_s3] sm:$0xff] }
 0x1a6   :  { %v96_v7 = vmul.f32 %v1146_v2, %v1243_v55  ;;  %v88_v14 = vmul.f32 %v1142_v57, %v87_v10 }
 0x1a7   :  { %161 = vrot.lane.b32.xlu2 %v1252_v3, %s1154_s2  ;;  %v428_v30 = vrot.slane %v1252_v3, 3  ;;  %v441_v32 = vperm.slane %v1252_v3, 0  ;;  %v426_v37 = vrot.slane %v1252_v3, 1  ;;  %v429_v38 = vrot.slane %v1252_v3, 4 }
 0x1a8   :  { %v97_v11 = vmul.f32 %v1146_v2, %v96_v7  ;;  %v89_v19 = vmul.f32 %v88_v14, %v1240_v46  ;;  %v432_v44 = vrot.slane %v1252_v3, 7  ;;  %v430_v45 = vrot.slane %v1252_v3, 5  ;;  %v233_v7 = vld [vmem:[%s1916_s3 + $0x30] sm:$0xff] }
 0x1a9   :  { %453 = vrot.lane.b32.xlu0 %v435_v5, %s1154_s2  ;;  %v444_v35 = vperm.slane %v428_v30, 0  ;;  %v442_v40 = vperm.slane %v426_v37, 0  ;;  %v445_v42 = vperm.slane %v429_v38, 0 }
 0x1aa   :  { %v98_v15 = vmul.f32 0.5, %v97_v11  ;;  %v91_v24 = vsel %vm90_vm6, %v1240_v46, %v89_v19  ;;  %v448_v46 = vperm.slane %v432_v44, 0  ;;  %v446_v48 = vperm.slane %v430_v45, 0 }
 0x1ab   :  { %455 = vrot.lane.b32.xlu1 %v436_v8, %s1154_s2  ;;  %v94_v28 = vsel %vm92_vm7, %v93_v26, %v91_v24  ;;  %v245_v8 = vld [vmem:[%s1916_s3 + $0x90] sm:$0xff]  ;;  %v228_v26 = vld [vmem:[%s1916_s3 + $0x8] sm:$0xff]  ;;  %vm1063_vm6 = vcmask 261249   ;;  %vm1065_vm7 = vcmask 261248  }
 0x1ac   :  { %v99_v20 = vsub.f32 1.5, %v98_v15  ;;  %v107_v31 = vadd.f32 1e-06, %v94_v28 }
 0x1ae   :  { %v100_v25 = vmul.f32 %v1146_v2, %v99_v20  ;;  %1147 = vrcp.f32 %v107_v31  ;;  %v229_v2 = vld [vmem:[%s1916_s3 + $0x10] sm:$0xff] }
 0x1b0   :  { %v101_v29 = vmul.f32 %v100_v25, %v1243_v55 }
 0x1b1   :  { %457 = vrot.lane.b32.xlu0 %v437_v13, %s1154_s2  ;;  %v255_v13 = vld [vmem:[%s1916_s3 + $0xe0] sm:$0xff] }
 0x1b2   :  { %v103_v33 = vsel %vm102_vm8, %v1243_v55, %v101_v29  ;;  %vm1067_vm8 = vcmask 254080  }
 0x1b3   :  { %459 = vrot.lane.b32.xlu1 %v438_v16, %s1154_s2  ;;  %v106_v36 = vsel %vm104_vm9, %v105_v34, %v103_v33 }
 0x1b4   :  { %v108_v39 = vadd.f32 1e-06, %v106_v36  ;;  %v1148_v41 = vpop.eup %1147 }
 0x1b5   :  { %v1281_v43 = vmul.f32 %v1148_v41, %v1226_v17  ;;  %v431_v17 = vrot.slane %v1252_v3, 6 }
 0x1b6   :  { %1149 = vrcp.f32 %v108_v39 }
 0x1b7   :  { %v447_v50 = vperm.slane %v431_v17, 0 }
 0x1b9   :  { %463 = vrot.lane.b32.xlu0 %v440_v22, %s1154_s2 }
 0x1bb   :  { %461 = vrot.lane.b32.xlu1 %v439_v27, %s1154_s2  ;;  %v230_v27 = vld [vmem:[%s1916_s3 + $0x18] sm:$0xff] }
 0x1bc   :  { %v1150_v47 = vpop.eup %1149 }
 0x1bd   :  { %v1289_v49 = vmul.f32 %v1150_v47, %v1232_v23  ;;  %v427_v23 = vrot.slane %v1252_v3, 2  ;;  %v239_v3 = vld [vmem:[%s1916_s3 + $0x60] sm:$0xff] }
 0x1bf   :  { %v443_v53 = vperm.slane %v427_v23, 0 }
 0x1c1   :  { %465 = vrot.lane.b32.xlu0 %v441_v32, %s1154_s2 }
 0x1c3   :  { %471 = vrot.lane.b32.xlu1 %v444_v35, %s1154_s2 }
 0x1c9   :  { %467 = vrot.lane.b32.xlu0 %v442_v40, %s1154_s2 }
 0x1cb   :  { %473 = vrot.lane.b32.xlu1 %v445_v42, %s1154_s2 }
 0x1cd   :  { %165 = vxpose.xlu2.b32.start [1/4] (short) (narrow) %v1281_v43, 16 }
 0x1d1   :  { %479 = vrot.lane.b32.xlu0 %v448_v46, %s1154_s2 }
 0x1d3   :  { %475 = vrot.lane.b32.xlu1 %v446_v48, %s1154_s2 }
 0x1d5   :  { %166 = vxpose.xlu2.b32.cont [2/4] (short) (narrow) %v1289_v49, 16 }
 0x1d9   :  { %477 = vrot.lane.b32.xlu0 %v447_v50, %s1154_s2 }
 0x1f9   :  { %v160_v51 = vpop.permute.xlu2 %159 }
 0x1fa   :  { %167 = vxpose.xlu2.b32.cont [3/4] (short) (narrow) %v160_v51, 16 }
 0x201   :  { %v162_v52 = vpop.permute.xlu2 %161 }
 0x202   :  { %216 = vmatpush.msra.mxu1 %v162_v52  ;;  %168 = vxpose.xlu2.b32.end [4/4] (short) (narrow) %v162_v52, 16 }
 0x204   :  { %217 = vmatpush.msra.mxu1 %v160_v51 }
 0x206   :  { %218 = vmatpush.msra.mxu1 %v1289_v49 }
 0x208   :  { %219 = vmatpush.msra.mxu1 %v1281_v43 }
 0x213   :  { %v1299_v56 = vpop.permute.xlu0 %449 }
 0x215   :  { %v1303_v58 = vpop.permute.xlu1 %451 }
 0x21b   :  { %v1301_v57 = vpop.permute.xlu0 %453 }
 0x21d   :  { %v1307_v60 = vpop.permute.xlu1 %455 }
 0x223   :  { %v1305_v59 = vpop.permute.xlu0 %457 }
 0x225   :  { %v1311_v62 = vpop.permute.xlu1 %459 }
 0x22b   :  { %v1309_v61 = vpop.permute.xlu0 %463 }
 0x22d   :  { %v1353_v14 = vpop.permute.xlu1 %461 }
 0x233   :  { %v1313_v63 = vpop.permute.xlu0 %465 }
 0x23b   :  { %v1371_v25 = vpop.permute.xlu0 %467 }
 0x26b   :  { %469 = vrot.lane.b32.xlu2 %v443_v53, %s1154_s2  ;;  %v1458_v53 = vpop.permute.xlu1 %471 }
 0x283   :  { %v181_v54 = vpop.trf.xlu2 }
 0x284   :  { %1079 = vmatmul.msk.f32.vlgmr.msra.gmra.mxu1 %vm197_vm10, %v181_v54 }
 0x28b   :  { %v182_v55 = vpop.trf.xlu2 }
 0x28c   :  { %1080 = vmatmul.msk.f32.gmra.mxu1 %vm197_vm10, %v182_v55 }
 0x301   :  { %v221_v1 = vpop.f32.mrf.mxu1 }
 0x302   :  { %v1327_v5 = vmul.f32 6.25e-05, %v221_v1 }
 0x304   :  { %v1339_v9 = vadd.f32 %v1327_v5, %v227_v0  ;;  %v1342_v10 = vadd.f32 %v1327_v5, %v229_v2  ;;  %v1345_v11 = vadd.f32 %v1327_v5, %v239_v3  ;;  %v1348_v12 = vadd.f32 %v1327_v5, %v247_v4 }
 0x305   :  { %v1356_v15 = vadd.f32 %v1327_v5, %v231_v6  ;;  %v1359_v16 = vadd.f32 %v1327_v5, %v233_v7  ;;  %v1365_v21 = vadd.f32 %v1327_v5, %v245_v8  ;;  %v1369_v24 = vadd.f32 %v1327_v5, %v255_v13  ;;  %v470_v13 = vpop.permute.xlu2 %469 }
 0x306   :  { %v1081_v18 = vclamps-f32 %v1339_v9, 1.0  ;;  %v1083_v19 = vclamps-f32 %v1342_v10, 1.0  ;;  %v1093_v20 = vclamps-f32 %v1345_v11, 1.0  ;;  %v1101_v22 = vclamps-f32 %v1348_v12, 1.0  ;;  %v1490_v10 = vpop.permute.xlu0 %479 }
 0x307   :  { %v1085_v28 = vclamps-f32 %v1356_v15, 1.0  ;;  %v1087_v33 = vclamps-f32 %v1359_v16, 1.0  ;;  %v1099_v37 = vclamps-f32 %v1365_v21, 1.0  ;;  %v1109_v38 = vclamps-f32 %v1369_v24, 1.0 }
 0x308   :  { %357 = vst.msk [vmem:[%s1917_s5] sm:$0xff] %vm76_vm1, %v1081_v18  ;;  %v391_v3 = vrot.slane %v1281_v43, 1  ;;  %v396_v8 = vrot.slane %v1281_v43, 6 }
 0x309   :  { %v224_v29 = vpop.f32.mrf.mxu1 }
 0x30a   :  { %v1400_v34 = vmul.f32 6.25e-05, %v224_v29 }
 0x30c   :  { %v262_v39 = vadd.f32 %v1400_v34, %v228_v26  ;;  %v264_v40 = vadd.f32 %v1400_v34, %v230_v27  ;;  %v1501_v26 = vsel %vm497_vm11, %v1281_v43, %v1299_v56  ;;  %v1519_v56 = vsel %vm497_vm11, %v391_v3, %v1303_v58 }
 0x30e   :  { %v1082_v17 = vclamps-f32 %v262_v39, 1.0  ;;  %v1084_v50 = vclamps-f32 %v264_v40, 1.0 }
 0x30f   :  { %v240_v30 = vld [vmem:[%s1916_s3 + $0x68] sm:$0xff] }
 0x310   :  { %v248_v31 = vld [vmem:[%s1916_s3 + $0xa8] sm:$0xff]  ;;  %v274_v41 = vadd.f32 %v1400_v34, %v240_v30  ;;  %531 = vmatpush.msra.mxu2 %v1082_v17  ;;  %554 = vmatpush.msra.mxu3 %v1084_v50 }
 0x311   :  { %359 = vst.msk [vmem:[%s1917_s5 + $0x10] sm:$0xff] %vm76_vm1, %v1083_v19  ;;  %v282_v42 = vadd.f32 %v1400_v34, %v248_v31  ;;  %v399_v31 = vrot.slane %v1289_v49, 2 }
 0x312   :  { %v1094_v51 = vclamps-f32 %v274_v41, 1.0  ;;  %532 = vmatpush.msra.mxu2 %v1081_v18  ;;  %555 = vmatpush.msra.mxu3 %v1083_v19 }
 0x313   :  { %v1102_v52 = vclamps-f32 %v282_v42, 1.0  ;;  %1113 = vmatmul.msk.f32.vlgmr.msra.gmra.mxu2 %vm76_vm1, %v1501_v26  ;;  %1114 = vmatmul.msk.f32.vlgmr.msra.gmra.mxu3 %vm76_vm1, %v1519_v56 }
 0x314   :  { %669 = vmatpush.msrb.mxu1 %v1094_v51 }
 0x315   :  { %761 = vmatpush.msrb.mxu0 %v1102_v52 }
 0x316   :  { %670 = vmatpush.msrb.mxu1 %v1093_v20 }
 0x317   :  { %762 = vmatpush.msrb.mxu0 %v1101_v22 }
 0x318   :  { %v232_v32 = vld [vmem:[%s1916_s3 + $0x28] sm:$0xff] }
 0x319   :  { %369 = vst.msk [vmem:[%s1917_s5 + $0x60] sm:$0xff] %vm76_vm1, %v1093_v20  ;;  %v266_v45 = vadd.f32 %v1400_v34, %v232_v32  ;;  %v1527_v32 = vsel %vm497_vm11, %v396_v8, %v1353_v14  ;;  %v1543_v14 = vsel %vm497_vm11, %v399_v31, %v470_v13 }
 0x31a   :  { %1119 = vmatmul.msk.f32.vlgmr.msrb.gmra.mxu1 %vm76_vm1, %v1527_v32  ;;  %1123 = vmatmul.msk.f32.vlgmr.msrb.gmra.mxu0 %vm76_vm1, %v1543_v14 }
 0x31b   :  { %v1086_v0 = vclamps-f32 %v266_v45, 1.0 }
 0x31d   :  { %577 = vmatpush.msrb.mxu2 %v1086_v0 }
 0x31f   :  { %578 = vmatpush.msrb.mxu2 %v1085_v28 }
 0x320   :  { %v234_v35 = vld [vmem:[%s1916_s3 + $0x38] sm:$0xff] }
 0x321   :  { %v246_v36 = vld [vmem:[%s1916_s3 + $0x98] sm:$0xff]  ;;  %v268_v46 = vadd.f32 %v1400_v34, %v234_v35 }
 0x322   :  { %377 = vst.msk [vmem:[%s1917_s5 + $0xa0] sm:$0xff] %vm76_vm1, %v1101_v22  ;;  %v1438_v47 = vadd.f32 %v1400_v34, %v246_v36 }
 0x323   :  { %v1088_v4 = vclamps-f32 %v268_v46, 1.0 }
 0x324   :  { %v1100_v27 = vclamps-f32 %v1438_v47, 1.0 }
 0x325   :  { %600 = vmatpush.msrb.mxu3 %v1088_v4 }
 0x326   :  { %738 = vmatpush.msra.mxu1 %v1100_v27 }
 0x327   :  { %601 = vmatpush.msrb.mxu3 %v1087_v33 }
 0x328   :  { %739 = vmatpush.msra.mxu1 %v1099_v37 }
 0x329   :  { %v256_v44 = vld [vmem:[%s1916_s3 + $0xe8] sm:$0xff] }
 0x32a   :  { %361 = vst.msk [vmem:[%s1917_s5 + $0x20] sm:$0xff] %vm76_vm1, %v1085_v28  ;;  %v290_v54 = vadd.f32 %v1400_v34, %v256_v44 }
 0x32b   :  { %363 = vst.msk [vmem:[%s1917_s5 + $0x30] sm:$0xff] %vm76_vm1, %v1087_v33  ;;  %v392_v33 = vrot.slane %v1281_v43, 2 }
 0x32c   :  { %v1110_v9 = vclamps-f32 %v290_v54, 1.0  ;;  %v478_v54 = vpop.permute.xlu0 %477 }
 0x32e   :  { %853 = vmatpush.msra.mxu0 %v1110_v9 }
 0x330   :  { %854 = vmatpush.msra.mxu0 %v1109_v38 }
 0x332   :  { %v236_v48 = vld [vmem:[%s1916_s3 + $0x48] sm:$0xff] }
 0x333   :  { %375 = vst.msk [vmem:[%s1917_s5 + $0x90] sm:$0xff] %vm76_vm1, %v1099_v37  ;;  %v1475_v1 = vadd.f32 %v1400_v34, %v236_v48  ;;  %v1585_v48 = vpop.permute.xlu1 %473 }
 0x335   :  { %v1090_v58 = vclamps-f32 %v1475_v1, 1.0 }
 0x337   :  { %623 = vmatpush.msra.mxu2 %v1090_v58 }
 0x33a   :  { %v238_v23 = vld [vmem:[%s1916_s3 + $0x58] sm:$0xff] }
 0x33b   :  { %385 = vst.msk [vmem:[%s1917_s5 + $0xe0] sm:$0xff] %vm76_vm1, %v1109_v38  ;;  %v272_v6 = vadd.f32 %v1400_v34, %v238_v23  ;;  %v393_v38 = vrot.slane %v1281_v43, 3  ;;  %v398_v23 = vrot.slane %v1289_v49, 1  ;;  %v476_v31 = vpop.permute.xlu1 %475 }
 0x33d   :  { %v1092_v20 = vclamps-f32 %v272_v6, 1.0  ;;  %v1644_v6 = vsel %vm497_vm11, %v398_v23, %v1371_v25 }
 0x33e   :  { %1122 = vmatmul.msk.f32.vlgmr.msra.gmra.mxu1 %vm76_vm1, %v1644_v6 }
 0x33f   :  { %646 = vmatpush.msra.mxu3 %v1092_v20 }
 0x342   :  { %v254_v55 = vld [vmem:[%s1916_s3 + $0xd8] sm:$0xff] }
 0x343   :  { %358 = vst.msk [vmem:[%s1917_s5 + $0x8] sm:$0xff] %vm76_vm1, %v1082_v17  ;;  %v288_v29 = vadd.f32 %v1400_v34, %v254_v55 }
 0x345   :  { %v1108_v36 = vclamps-f32 %v288_v29, 1.0  ;;  %v394_v29 = vrot.slane %v1281_v43, 4 }
 0x347   :  { %830 = vmatpush.msrb.mxu1 %v1108_v36 }
 0x34a   :  { %v235_v2 = vld [vmem:[%s1916_s3 + $0x40] sm:$0xff] }
 0x34b   :  { %360 = vst.msk [vmem:[%s1917_s5 + $0x18] sm:$0xff] %vm76_vm1, %v1084_v50  ;;  %v269_v18 = vadd.f32 %v1327_v5, %v235_v2  ;;  %v403_v2 = vrot.slane %v1289_v49, 6 }
 0x34d   :  { %v1089_v41 = vclamps-f32 %v269_v18, 1.0  ;;  %v1654_v8 = vsel %vm497_vm11, %v403_v2, %v478_v54  ;;  %v1685_v18 = vsel %vm497_vm11, %v394_v29, %v1305_v59 }
 0x34e   :  { %1127 = vmatmul.msk.f32.vlgmr.msra.gmra.mxu0 %vm76_vm1, %v1654_v8 }
 0x34f   :  { %624 = vmatpush.msra.mxu2 %v1089_v41 }
 0x352   :  { %v237_v7 = vld [vmem:[%s1916_s3 + $0x50] sm:$0xff] }
 0x353   :  { %370 = vst.msk [vmem:[%s1917_s5 + $0x68] sm:$0xff] %vm76_vm1, %v1094_v51  ;;  %v271_v11 = vadd.f32 %v1327_v5, %v237_v7 }
 0x355   :  { %v1091_v45 = vclamps-f32 %v271_v11, 1.0 }
 0x357   :  { %647 = vmatpush.msra.mxu3 %v1091_v45 }
 0x35a   :  { %v253_v30 = vld [vmem:[%s1916_s3 + $0xd0] sm:$0xff] }
 0x35b   :  { %378 = vst.msk [vmem:[%s1917_s5 + $0xa8] sm:$0xff] %vm76_vm1, %v1102_v52  ;;  %v287_v22 = vadd.f32 %v1327_v5, %v253_v30  ;;  %v1619_v52 = vsel %vm497_vm11, %v392_v33, %v1301_v57  ;;  %v1632_v57 = vsel %vm497_vm11, %v393_v38, %v1307_v60  ;;  %v395_v30 = vrot.slane %v1281_v43, 5 }
 0x35c   :  { %1115 = vmatmul.msk.f32.vlgmr.msrb.gmra.mxu2 %vm76_vm1, %v1619_v52  ;;  %1116 = vmatmul.msk.f32.vlgmr.msrb.gmra.mxu3 %vm76_vm1, %v1632_v57 }
 0x35d   :  { %v1107_v15 = vclamps-f32 %v287_v22, 1.0  ;;  %v404_v22 = vrot.slane %v1289_v49, 7 }
 0x35f   :  { %831 = vmatpush.msrb.mxu1 %v1107_v15 }
 0x362   :  { %v242_v19 = vld [vmem:[%s1916_s3 + $0x78] sm:$0xff] }
 0x363   :  { %362 = vst.msk [vmem:[%s1917_s5 + $0x28] sm:$0xff] %vm76_vm1, %v1086_v0  ;;  %v276_v39 = vadd.f32 %v1400_v34, %v242_v19  ;;  %v402_v19 = vrot.slane %v1289_v49, 5 }
 0x364   :  { %1117 = vmatmul.msk.f32.vlgmr.msra.gmra.mxu2 %vm76_vm1, %v1685_v18 }
 0x365   :  { %v1096_v21 = vclamps-f32 %v276_v39, 1.0  ;;  %v1703_v59 = vsel %vm497_vm11, %v402_v19, %v476_v31 }
 0x366   :  { %1126 = vmatmul.msk.f32.vlgmr.msrb.gmra.mxu1 %vm76_vm1, %v1703_v59 }
 0x367   :  { %692 = vmatpush.msrb.mxu2 %v1096_v21 }
 0x36a   :  { %v244_v12 = vld [vmem:[%s1916_s3 + $0x88] sm:$0xff] }
 0x36b   :  { %364 = vst.msk [vmem:[%s1917_s5 + $0x38] sm:$0xff] %vm76_vm1, %v1088_v4  ;;  %v278_v42 = vadd.f32 %v1400_v34, %v244_v12  ;;  %v1725_v12 = vsel %vm497_vm11, %v1289_v49, %v1313_v63 }
 0x36d   :  { %v1098_v17 = vclamps-f32 %v278_v42, 1.0 }
 0x36f   :  { %715 = vmatpush.msrb.mxu3 %v1098_v17 }
 0x372   :  { %v241_v35 = vld [vmem:[%s1916_s3 + $0x70] sm:$0xff] }
 0x373   :  { %376 = vst.msk [vmem:[%s1917_s5 + $0x98] sm:$0xff] %vm76_vm1, %v1100_v27  ;;  %v275_v46 = vadd.f32 %v1327_v5, %v241_v35  ;;  %v1748_v35 = vsel %vm497_vm11, %v404_v22, %v1490_v10 }
 0x375   :  { %v1095_v55 = vclamps-f32 %v275_v46, 1.0 }
 0x377   :  { %693 = vmatpush.msrb.mxu2 %v1095_v55 }
 0x37a   :  { %v243_v40 = vld [vmem:[%s1916_s3 + $0x80] sm:$0xff] }
 0x37b   :  { %386 = vst.msk [vmem:[%s1917_s5 + $0xe8] sm:$0xff] %vm76_vm1, %v1110_v9  ;;  %v277_v16 = vadd.f32 %v1327_v5, %v243_v40 }
 0x37d   :  { %v1097_v3 = vclamps-f32 %v277_v16, 1.0 }
 0x37f   :  { %716 = vmatpush.msrb.mxu3 %v1097_v3 }
 0x382   :  { %v250_v44 = vld [vmem:[%s1916_s3 + $0xb8] sm:$0xff] }
 0x383   :  { %366 = vst.msk [vmem:[%s1917_s5 + $0x48] sm:$0xff] %vm76_vm1, %v1090_v58  ;;  %v284_v24 = vadd.f32 %v1400_v34, %v250_v44  ;;  %v1694_v58 = vsel %vm497_vm11, %v395_v30, %v1311_v62  ;;  %v397_v62 = vrot.slane %v1281_v43, 7  ;;  %v401_v43 = vrot.slane %v1289_v49, 4 }
 0x384   :  { %1118 = vmatmul.msk.f32.vlgmr.msra.gmra.mxu3 %vm76_vm1, %v1694_v58 }
 0x385   :  { %v1104_v60 = vclamps-f32 %v284_v24, 1.0  ;;  %v1720_v11 = vsel %vm497_vm11, %v397_v62, %v1309_v61  ;;  %v1739_v63 = vsel %vm497_vm11, %v401_v43, %v1585_v48 }
 0x386   :  { %1120 = vmatmul.msk.f32.vlgmr.msrb.gmra.mxu2 %vm76_vm1, %v1720_v11 }
 0x387   :  { %784 = vmatpush.msra.mxu2 %v1104_v60 }
 0x38a   :  { %v252_v47 = vld [vmem:[%s1916_s3 + $0xc8] sm:$0xff] }
 0x38b   :  { %368 = vst.msk [vmem:[%s1917_s5 + $0x58] sm:$0xff] %vm76_vm1, %v1092_v20  ;;  %v286_v50 = vadd.f32 %v1400_v34, %v252_v47  ;;  %v400_v20 = vrot.slane %v1289_v49, 3 }
 0x38c   :  { %1121 = vmatmul.msk.f32.vlgmr.msrb.gmra.mxu3 %vm76_vm1, %v1725_v12 }
 0x38d   :  { %v1106_v25 = vclamps-f32 %v286_v50, 1.0  ;;  %v1735_v61 = vsel %vm497_vm11, %v400_v20, %v1458_v53 }
 0x38f   :  { %807 = vmatpush.msra.mxu3 %v1106_v25 }
 0x392   :  { %v249_v28 = vld [vmem:[%s1916_s3 + $0xb0] sm:$0xff] }
 0x393   :  { %384 = vst.msk [vmem:[%s1917_s5 + $0xd8] sm:$0xff] %vm76_vm1, %v1108_v36  ;;  %v283_v0 = vadd.f32 %v1327_v5, %v249_v28 }
 0x396   :  { %v1760_v49 = vpop.f32.mrf.mxu2  ;;  %v1762_v10 = vpop.f32.mrf.mxu3 }
 0x397   :  { %v1752_v53 = vpop.f32.mrf.mxu1  ;;  %v1754_v36 = vpop.f32.mrf.mxu0  ;;  %v886_v44 = vsel %vm882_vm12, %v1762_v10, 0.0 }
 0x398   :  { %v913_v39 = vsel %vm882_vm12, %v1754_v36, 0.0  ;;  %v901_v40 = vsel %vm882_vm12, %v1752_v53, 0.0 }
 0x399   :  { %914 = vadd.xlane.f32.xlu0 %v913_v39  ;;  %902 = vadd.xlane.f32.xlu2 %v901_v40 }
 0x39a   :  { %v251_v37 = vld [vmem:[%s1916_s3 + $0xc0] sm:$0xff] }
 0x39b   :  { %365 = vst.msk [vmem:[%s1917_s5 + $0x40] sm:$0xff] %vm76_vm1, %v1089_v41  ;;  %v285_v4 = vadd.f32 %v1327_v5, %v251_v37  ;;  %v883_v41 = vsel %vm882_vm12, %v1760_v49, 0.0 }
 0x39c   :  { %884 = vadd.xlane.f32.xlu1 %v883_v41 }
 0x39d   :  { %v1105_v27 = vclamps-f32 %v285_v4, 1.0 }
 0x39f   :  { %808 = vmatpush.msra.mxu3 %v1105_v27 }
 0x3a0   :  { %1125 = vmatmul.msk.f32.vlgmr.msra.gmra.mxu3 %vm76_vm1, %v1739_v63 }
 0x3a1   :  { %887 = vadd.xlane.f32.xlu0 %v886_v44 }
 0x3a2   :  { %v258_v51 = vld [vmem:[%s1916_s3 + $0xf8] sm:$0xff] }
 0x3a3   :  { %367 = vst.msk [vmem:[%s1917_s5 + $0x50] sm:$0xff] %vm76_vm1, %v1091_v45  ;;  %v292_v7 = vadd.f32 %v1400_v34, %v258_v51  ;;  %v1103_v34 = vclamps-f32 %v283_v0, 1.0 }
 0x3a5   :  { %785 = vmatpush.msra.mxu2 %v1103_v34 }
 0x3a6   :  { %1124 = vmatmul.msk.f32.vlgmr.msra.gmra.mxu2 %vm76_vm1, %v1735_v61 }
 0x3aa   :  { %v257_v1 = vld [vmem:[%s1916_s3 + $0xf0] sm:$0xff] }
 0x3ab   :  { %383 = vst.msk [vmem:[%s1917_s5 + $0xd0] sm:$0xff] %vm76_vm1, %v1107_v15  ;;  %v291_v13 = vadd.f32 %v1327_v5, %v257_v1  ;;  %v1112_v5 = vclamps-f32 %v292_v7, 1.0 }
 0x3ac   :  { %372 = vst.msk [vmem:[%s1917_s5 + $0x78] sm:$0xff] %vm76_vm1, %v1096_v21 }
 0x3ad   :  { %374 = vst.msk [vmem:[%s1917_s5 + $0x88] sm:$0xff] %vm76_vm1, %v1098_v17  ;;  %v1111_v9 = vclamps-f32 %v291_v13, 1.0  ;;  %876 = vmatpush.msrb.mxu2 %v1112_v5 }
 0x3ae   :  { %371 = vst.msk [vmem:[%s1917_s5 + $0x70] sm:$0xff] %vm76_vm1, %v1095_v55 }
 0x3af   :  { %373 = vst.msk [vmem:[%s1917_s5 + $0x80] sm:$0xff] %vm76_vm1, %v1097_v3  ;;  %877 = vmatpush.msrb.mxu2 %v1111_v9 }
 0x3b0   :  { %380 = vst.msk [vmem:[%s1917_s5 + $0xb8] sm:$0xff] %vm76_vm1, %v1104_v60  ;;  %1128 = vmatmul.msk.f32.vlgmr.msrb.gmra.mxu2 %vm76_vm1, %v1748_v35 }
 0x3b1   :  { %382 = vst.msk [vmem:[%s1917_s5 + $0xc8] sm:$0xff] %vm76_vm1, %v1106_v25  ;;  %v1155_v25 = vmov 16.0  }
 0x3b2   :  { %379 = vst.msk [vmem:[%s1917_s5 + $0xb0] sm:$0xff] %vm76_vm1, %v1103_v34  ;;  %1151 = vrcp.f32 %v1155_v25 }
 0x3b3   :  { %381 = vst.msk [vmem:[%s1917_s5 + $0xc0] sm:$0xff] %vm76_vm1, %v1105_v27 }
 0x3b4   :  { %388 = vst.msk [vmem:[%s1917_s5 + $0xf8] sm:$0xff] %vm76_vm1, %v1112_v5 }
 0x3b5   :  { %387 = vst.msk [vmem:[%s1917_s5 + $0xf0] sm:$0xff] %vm76_vm1, %v1111_v9  ;;  %s1156_s5 = smov 16  }
 0x3b8   :  { %v1152_v27 = vpop.eup %1151 }
 0x3b9   :  { %v932_v5 = vmul.f32 16.0, %v1152_v27  ;;  %vm936_vm13 = vweird.f32 %v1152_v27 }
 0x3bb   :  { %v1766_v42 = vpop.f32.mrf.mxu1  ;;  %v933_v31 = vsub.f32 1.0, %v932_v5 }
 0x3bc   :  { %v910_v46 = vsel %vm882_vm12, %v1766_v42, 0.0 }
 0x3bd   :  { %911 = vadd.xlane.f32.xlu1 %v910_v46  ;;  %v934_v19 = vmul.f32 %v1152_v27, %v933_v31 }
 0x3bf   :  { %v935_v62 = vadd.f32 %v1152_v27, %v934_v19 }
 0x3c1   :  { %v1816_v22 = vsel %vm936_vm13, %v1152_v27, %v935_v62 }
 0x3cb   :  { %v1774_v47 = vpop.f32.mrf.mxu0 }
 0x3cc   :  { %v925_v15 = vsel %vm882_vm12, %v1774_v47, 0.0 }
 0x3cd   :  { %926 = vadd.xlane.f32.xlu0 %v925_v15 }
 0x3df   :  { %v1770_v45 = vpop.f32.mrf.mxu2  ;;  %v1776_v48 = vpop.f32.mrf.mxu3 }
 0x3e0   :  { %v889_v24 = vsel %vm882_vm12, %v1770_v45, 0.0  ;;  %v892_v17 = vsel %vm882_vm12, %v1776_v48, 0.0 }
 0x3e1   :  { %890 = vadd.xlane.f32.xlu0 %v889_v24 }
 0x3e3   :  { %v1780_v16 = vpop.f32.mrf.mxu1 }
 0x3e4   :  { %v922_v33 = vsel %vm882_vm12, %v1780_v16, 0.0 }
 0x3e5   :  { %923 = vadd.xlane.f32.xlu1 %v922_v33 }
 0x3e7   :  { %v1782_v28 = vpop.f32.mrf.mxu2 }
 0x3e8   :  { %v895_v23 = vsel %vm882_vm12, %v1782_v28, 0.0 }
 0x3e9   :  { %893 = vadd.xlane.f32.xlu0 %v892_v17 }
 0x3f1   :  { %896 = vadd.xlane.f32.xlu0 %v895_v23 }
 0x407   :  { %v1786_v21 = vpop.f32.mrf.mxu3 }
 0x408   :  { %v898_v0 = vsel %vm882_vm12, %v1786_v21, 0.0 }
 0x409   :  { %v1790_v37 = vpop.f32.mrf.mxu2  ;;  %899 = vadd.xlane.f32.xlu0 %v898_v0 }
 0x40a   :  { %v904_v38 = vsel %vm882_vm12, %v1790_v37, 0.0 }
 0x40b   :  { %905 = vadd.xlane.f32.xlu1 %v904_v38 }
 0x40c   :  { %v915_v60 = vpop.xlane.xlu0 %914  ;;  %v903_v39 = vpop.xlane.xlu2 %902 }
 0x40d   :  { %v944_v41 = vmul.f32 %v1816_v22, %v903_v39  ;;  %v948_v44 = vmul.f32 %v1816_v22, %v915_v60 }
 0x40f   :  { %v1796_v50 = vpop.f32.mrf.mxu3  ;;  %v885_v7 = vpop.xlane.xlu1 %884  ;;  %v964_v0 = vsub.f32 %v1754_v36, %v948_v44 }
 0x410   :  { %v907_v51 = vsel %vm882_vm12, %v1796_v50, 0.0  ;;  %v938_v24 = vmul.f32 %v1816_v22, %v885_v7 }
 0x412   :  { %v954_v7 = vsub.f32 %v1760_v49, %v938_v24 }
 0x413   :  { %908 = vadd.xlane.f32.xlu1 %v907_v51 }
 0x414   :  { %v888_v13 = vpop.xlane.xlu0 %887 }
 0x415   :  { %v939_v40 = vmul.f32 %v1816_v22, %v888_v13 }
 0x417   :  { %v955_v15 = vsub.f32 %v1762_v10, %v939_v40 }
 0x423   :  { %v1808_v1 = vpop.f32.mrf.mxu3 }
 0x424   :  { %v919_v2 = vsel %vm882_vm12, %v1808_v1, 0.0 }
 0x429   :  { %v1802_v54 = vpop.f32.mrf.mxu2 }
 0x42a   :  { %v916_v55 = vsel %vm882_vm12, %v1802_v54, 0.0 }
 0x42b   :  { %917 = vadd.xlane.f32.xlu1 %v916_v55  ;;  %v960_v55 = vsub.f32 %v1752_v53, %v944_v41 }
 0x42d   :  { %v976_v27 = vadd.f32 %v960_v55, %v1527_v32 }
 0x42f   :  { %v1017_v19 = vrot.slane %v976_v27, 2 }
 0x430   :  { %v912_v34 = vpop.xlane.xlu1 %911 }
 0x431   :  { %v947_v38 = vmul.f32 %v1816_v22, %v912_v34 }
 0x433   :  { %920 = vadd.xlane.f32.xlu1 %v919_v2  ;;  %v1812_v3 = vpop.f32.mrf.mxu2  ;;  %v963_v25 = vsub.f32 %v1766_v42, %v947_v38 }
 0x434   :  { %v928_v4 = vsel %vm882_vm12, %v1812_v3, 0.0 }
 0x43b   :  { %929 = vadd.xlane.f32.xlu1 %v928_v4  ;;  %v971_v4 = vadd.f32 %v955_v15, %v1519_v56  ;;  %v1841_v56 = vadd.f32 %v964_v0, %v1543_v14 }
 0x43d   :  { %v1002_v5 = vrot.slane %v971_v4, 7 }
 0x440   :  { %v927_v29 = vpop.xlane.xlu0 %926 }
 0x441   :  { %v952_v34 = vmul.f32 %v1816_v22, %v927_v29  ;;  %v970_v29 = vadd.f32 %v954_v7, %v1501_v26 }
 0x443   :  { %v968_v14 = vsub.f32 %v1774_v47, %v952_v34  ;;  %v1041_v47 = vsel %vm1006_vm15, %v1002_v5, %v970_v29 }
 0x454   :  { %v891_v9 = vpop.xlane.xlu0 %890 }
 0x455   :  { %v940_v33 = vmul.f32 %v1816_v22, %v891_v9 }
 0x457   :  { %v956_v10 = vsub.f32 %v1770_v45, %v940_v33 }
 0x458   :  { %v924_v30 = vpop.xlane.xlu1 %923 }
 0x459   :  { %v972_v49 = vadd.f32 %v956_v10, %v1619_v52 }
 0x45c   :  { %v894_v43 = vpop.xlane.xlu0 %893 }
 0x45d   :  { %v941_v17 = vmul.f32 %v1816_v22, %v894_v43  ;;  %v984_v43 = vadd.f32 %v968_v14, %v1654_v8 }
 0x45f   :  { %v957_v13 = vsub.f32 %v1776_v48, %v941_v17 }
 0x461   :  { %v973_v32 = vadd.f32 %v957_v13, %v1632_v57 }
 0x464   :  { %v897_v23 = vpop.xlane.xlu0 %896 }
 0x465   :  { %v942_v2 = vmul.f32 %v1816_v22, %v897_v23 }
 0x467   :  { %v958_v36 = vsub.f32 %v1782_v28, %v942_v2  ;;  %v951_v28 = vmul.f32 %v1816_v22, %v924_v30 }
 0x469   :  { %v974_v9 = vadd.f32 %v958_v36, %v1685_v18  ;;  %v967_v39 = vsub.f32 %v1780_v16, %v951_v28 }
 0x47c   :  { %v900_v52 = vpop.xlane.xlu0 %899 }
 0x47d   :  { %v943_v26 = vmul.f32 %v1816_v22, %v900_v52 }
 0x47e   :  { %v906_v20 = vpop.xlane.xlu1 %905 }
 0x47f   :  { %v945_v51 = vmul.f32 %v1816_v22, %v906_v20  ;;  %v1005_v20 = vrot.slane %v972_v49, 6  ;;  %v959_v18 = vsub.f32 %v1786_v21, %v943_v26 }
 0x481   :  { %v961_v53 = vsub.f32 %v1790_v37, %v945_v51  ;;  %v979_v37 = vadd.f32 %v963_v25, %v1644_v6  ;;  %v1004_v6 = vsel %vm1003_vm14, %v1002_v5, %v970_v29  ;;  %v975_v44 = vadd.f32 %v959_v18, %v1694_v58 }
 0x482   :  { %v1042_v15 = vsel %vm1009_vm0, %v1005_v20, %v1041_v47 }
 0x483   :  { %v977_v31 = vadd.f32 %v961_v53, %v1720_v11  ;;  %v1023_v30 = vrot.slane %v979_v37, 7  ;;  %v1008_v11 = vrot.slane %v973_v32, 5  ;;  %v1014_v16 = vrot.slane %v975_v44, 3 }
 0x484   :  { %v1033_v53 = vrot.slane %v984_v43, 2 }
 0x485   :  { %v1020_v40 = vrot.slane %v977_v31, 1  ;;  %v1043_v24 = vsel %vm1012_vm2, %v1008_v11, %v1042_v15 }
 0x486   :  { %v909_v46 = vpop.xlane.xlu1 %908 }
 0x487   :  { %v946_v60 = vmul.f32 %v1816_v22, %v909_v46 }
 0x489   :  { %v962_v42 = vsub.f32 %v1796_v50, %v946_v60  ;;  %v1025_v50 = vrot.slane %v1841_v56, 6 }
 0x48b   :  { %v978_v57 = vadd.f32 %v962_v42, %v1725_v12  ;;  %v1007_v12 = vsel %vm1006_vm15, %v1005_v20, %v1004_v6 }
 0x48c   :  { %v1010_v8 = vsel %vm1009_vm0, %v1008_v11, %v1007_v12 }
 0x48d   :  { %v1047_v33 = vsel %vm1003_vm14, %v978_v57, %v1020_v40  ;;  %v1024_v2 = vsel %vm1003_vm14, %v1023_v30, %v978_v57 }
 0x48e   :  { %v1048_v51 = vsel %vm1006_vm15, %v1023_v30, %v1047_v33  ;;  %v1026_v13 = vsel %vm1006_vm15, %v1025_v50, %v1024_v2 }
 0x48f   :  { %v1049_v7 = vsel %vm1009_vm0, %v1025_v50, %v1048_v51 }
 0x49e   :  { %v918_v45 = vpop.xlane.xlu1 %917 }
 0x49f   :  { %v949_v48 = vmul.f32 %v1816_v22, %v918_v45 }
 0x4a1   :  { %v965_v62 = vsub.f32 %v1802_v54, %v949_v48  ;;  %v1011_v54 = vrot.slane %v974_v9, 4 }
 0x4a3   :  { %v981_v41 = vadd.f32 %v965_v62, %v1735_v61  ;;  %v983_v61 = vadd.f32 %v967_v39, %v1703_v59  ;;  %v1013_v58 = vsel %vm1012_vm2, %v1011_v54, %v1010_v8  ;;  %v1044_v17 = vsel %vm1015_vm3, %v1011_v54, %v1043_v24 }
 0x4a4   :  { %v1016_v55 = vsel %vm1015_vm3, %v1014_v16, %v1013_v58  ;;  %v1045_v0 = vsel %vm1018_vm4, %v1014_v16, %v1044_v17 }
 0x4a5   :  { %v1027_v23 = vrot.slane %v981_v41, 5  ;;  %v1046_v10 = vsel %vm1021_vm5, %v1017_v19, %v1045_v0  ;;  %v1019_v59 = vsel %vm1018_vm4, %v1017_v19, %v1016_v55  ;;  %v1031_v25 = vrot.slane %v983_v61, 3 }
 0x4a6   :  { %v921_v46 = vpop.xlane.xlu1 %920  ;;  %1054 = vrot.lane.b32.xlu0 %v1046_v10, %s1156_s5 }
 0x4a7   :  { %v950_v21 = vmul.f32 %v1816_v22, %v921_v46  ;;  %v1050_v34 = vsel %vm1012_vm2, %v1027_v23, %v1049_v7  ;;  %v1028_v36 = vsel %vm1009_vm0, %v1027_v23, %v1026_v13 }
 0x4a9   :  { %v966_v38 = vsub.f32 %v1808_v1, %v950_v21  ;;  %v1022_v1 = vsel %vm1021_vm5, %v1020_v40, %v1019_v59 }
 0x4aa   :  { %1039 = vst.msk [vmem:[%s1918_s4] sm:$0xff] %vm76_vm1, %v1022_v1 }
 0x4ab   :  { %v982_v4 = vadd.f32 %v966_v38, %v1739_v63 }
 0x4ad   :  { %v1029_v60 = vrot.slane %v982_v4, 4 }
 0x4ae   :  { %v930_v63 = vpop.xlane.xlu1 %929 }
 0x4af   :  { %v953_v27 = vmul.f32 %v1816_v22, %v930_v63  ;;  %v1051_v56 = vsel %vm1015_vm3, %v1029_v60, %v1050_v34  ;;  %v1030_v45 = vsel %vm1012_vm2, %v1029_v60, %v1028_v36 }
 0x4b0   :  { %v1052_v5 = vsel %vm1018_vm4, %v1031_v25, %v1051_v56  ;;  %v1032_v48 = vsel %vm1015_vm3, %v1031_v25, %v1030_v45 }
 0x4b1   :  { %v969_v49 = vsub.f32 %v1812_v3, %v953_v27  ;;  %v1053_v42 = vsel %vm1021_vm5, %v1033_v53, %v1052_v5  ;;  %v1034_v32 = vsel %vm1018_vm4, %v1033_v53, %v1032_v48 }
 0x4b2   :  { %1056 = vrot.lane.b32.xlu1 %v1053_v42, %s1156_s5 }
 0x4b3   :  { %v985_v29 = vadd.f32 %v969_v49, %v1748_v35 }
 0x4b5   :  { %v1035_v37 = vrot.slane %v985_v29, 1 }
 0x4b7   :  { %v1036_v22 = vsel %vm1021_vm5, %v1035_v37, %v1034_v32  ;;  %1058 = vrot.lane.b32.xlu0 %v1035_v37, %s1156_s5 }
 0x4b8   :  { %1040 = vst.msk [vmem:[%s1918_s4 + $0x8] sm:$0xff] %vm76_vm1, %v1036_v22 }
 0x518   :  { %v1055_v3 = vpop.permute.xlu0 %1054 }
 0x519   :  { %1064 = vst.msk [vmem:[%s1918_s4 - $0x1] sm:$0xfe] %vm1063_vm6, %v1055_v3 }
 0x524   :  { %v1057_v14 = vpop.permute.xlu1 %1056 }
 0x525   :  { %1066 = vst.msk [vmem:[%s1918_s4 + $0x7] sm:$0xff] %vm1065_vm7, %v1057_v14 }
 0x529   :  { %v1059_v35 = vpop.permute.xlu0 %1058 }
 0x52a   :  { %1068 = vst.msk [vmem:[%s1918_s4 + $0xf] sm:$0x1] %vm1067_vm8, %v1059_v35 }

</bundles_post_ra>
